<compile_context>
chip_gen: v7x
topology: tpu7x:2x2x1
jax: 0.10.0
libtpu: 0.0.40
codegen_flags: <defaults>
</compile_context>

<pallas_src>
import math
import jax
import jax.numpy as jnp
from jax import lax
from jax.experimental import pallas as pl
from jax.experimental.pallas import tpu as pltpu

# ---------------------------------------------------------------- constants
R_MAX = 4.0
NUM_BASIS = 8          # BesselBasis(num_basis=8)
POLY_P = 6.0           # PolynomialCutoff default p
SH_DIM = 1 + 3         # irreps['edge'] = [0, 1]  ->  l=0 (1) + l=1 (3)
N_NODES = 8
N_EDGES = 32
C_FEAT = 16            # node feature channels (input == output across layers)
C_ATTR = 4             # node_attr channels
D_QK = 16              # irreps['query'] / irreps['key'] channel counts
FC_NEURONS = 8         # fc_neurons (== num_basis here)
INV_LAYERS = 3         # invariant_layers
INV_NEURONS = 8        # invariant_neurons
N_LAYERS = 2           # len(irreps_list)


def _full_spec(shape):
    nd = len(shape)
    return pl.BlockSpec(shape, lambda i, nd=nd: (0,) * nd)


# ---------------------------------------------------------------- fused kernel
# Inputs: edge_vec, bessel_w, x, node_attr, edge_src, edge_dst, then 5 packed
# weight tensors per layer.  Gather/scatter one-hots are built in-kernel from
# the int32 index vectors, so the whole hot path (MXU matmuls + EUP
# exp/sigmoid/rsqrt + XLU reductions) lives in one kernel with no intermediate
# HBM round-trips and no (E, N) HBM traffic.
def _fused_kernel(*refs):
    f32 = jnp.float32
    vec_ref, bw_ref, x_ref, attr_ref, src_ref, dst_ref = refs[:6]
    out_ref = refs[-1]
    layer_refs = refs[6:-1]                                 # 5 refs per layer

    E, N, C = N_EDGES, N_NODES, C_FEAT

    # --------------------------- edge geometry (computed once, kept in VMEM)
    vec = vec_ref[...]                                      # (E, 3)
    r2 = jnp.sum(vec * vec, axis=-1, keepdims=True)
    r = jnp.sqrt(r2)                                        # (E, 1)
    inv_r = pl.reciprocal(jnp.maximum(r, 1e-12))            # guard zero-length edges

    # Bessel basis (trainable weights bw = pi * [1..num_basis] at init)
    bw = bw_ref[...]                                        # (1, NUM_BASIS)
    bessel = (2.0 / R_MAX) * jnp.sin(bw * (r * (1.0 / R_MAX))) * inv_r

    # Polynomial cutoff, p = 6
    xr = r * (1.0 / R_MAX)
    x2 = xr * xr
    x4 = x2 * x2
    x6 = x4 * x2
    x7 = x6 * xr
    x8 = x7 * xr
    p = POLY_P
    cut = (1.0
           - ((p + 1.0) * (p + 2.0) / 2.0) * x6
           + p * (p + 2.0) * x7
           - (p * (p + 1.0) / 2.0) * x8)
    cut = cut * (xr < 1.0).astype(f32)                      # (E, 1)

    scal = bessel * cut                                     # edge_scalars (E, NUM_BASIS)
    # Spherical harmonics kept implicit: l=0 channel (=1) and the sqrt(3) /
    # e3nn (y,z,x) ordering of the l=1 channels are folded into wkv at
    # param-pack time, so the kernel only needs the unit vector.
    unit = vec * inv_r                                      # (E, 3)

    # ------------- one-hot gather/scatter matrices built in-kernel (exact)
    node_iota = lax.broadcasted_iota(jnp.int32, (E, N), 1)
    src_mask = node_iota == src_ref[...]                    # (E, N) bool
    dst_mask = node_iota == dst_ref[...]
    src_oh = src_mask.astype(f32)
    dst_oh = dst_mask.astype(f32)

    x = x_ref[...]                                          # (N, C)
    attr = attr_ref[...]                                    # (N, A)

    # ------------- lane broadcasts hoisted out of the layer loop
    u_b = [jnp.broadcast_to(unit[:, i:i + 1], (E, C)) for i in range(3)]
    a_b = [jnp.broadcast_to(attr[:, b:b + 1], (N, C)) for b in range(C_ATTR)]

    scatter_dims = (((0,), (0,)), ((), ()))                 # dst_oh^T @ (.) on the MXU

    for l in range(N_LAYERS):
        wnode_ref, wkv_ref, fch0_ref, fchh_ref, fco_ref = \
            layer_refs[5 * l:5 * l + 5]

        # node-side: query + node_attr self-connection in ONE matmul
        # xcat = [x | x*a0 | x*a1 | x*a2 | x*a3]  (N, C + A*C)
        xcat = jnp.concatenate([x] + [x * a_b[b] for b in range(C_ATTR)],
                               axis=-1)
        qsc = jnp.dot(xcat, wnode_ref[...], preferred_element_type=f32)  # (N, Dq+C)
        q = qsc[:, :D_QK]                                                # (N, Dq)
        sc = qsc[:, D_QK:]                                               # (N, C)

        # gathers via in-kernel one-hot matmuls (exact)
        xs = jnp.dot(src_oh, x, preferred_element_type=f32)              # (E, C)
        qd = jnp.dot(dst_oh, q, preferred_element_type=f32)              # (E, Dq)

        # merged radial (invariant) MLP -> [rk | rv] in one pass
        h = jax.nn.silu(jnp.dot(scal, fch0_ref[...],
                                preferred_element_type=f32))             # (E, 2H)
        for j in range(INV_LAYERS - 1):
            h = jax.nn.silu(jnp.dot(h, fchh_ref[j],
                                    preferred_element_type=f32))         # block-diag
        r_out = jnp.dot(h, fco_ref[...], preferred_element_type=f32)     # (E, Dq+C)

        # tensor-product key/value messages packed into ONE matmul:
        # xsh = [xs | xs*ux | xs*uy | xs*uz]  (E, 4C)
        xsh = jnp.concatenate([xs, xs * u_b[0], xs * u_b[1], xs * u_b[2]],
                              axis=-1)
        kv = jnp.dot(xsh, wkv_ref[...], preferred_element_type=f32)      # (E, Dq+C)
        kv = kv * r_out                                                  # radial gate
        k = kv[:, :D_QK]
        v = kv[:, D_QK:]

        # per-destination softmax over incoming edges (stabilized)
        logit = jnp.sum(qd * k, axis=-1, keepdims=True)                  # (E, 1)
        masked = jnp.where(dst_mask, logit, jnp.float32(-1e30))          # (E, N)
        lmax_n = jnp.max(masked, axis=0, keepdims=True)                  # (1, N)
        lmax_e = jnp.sum(dst_oh * lmax_n, axis=-1, keepdims=True)        # (E, 1)
        w = jnp.exp(logit - lmax_e) * cut                                # (E, 1)

        # fused scatter of [w | sqrt(w)*v] -> (N, 1+C) in ONE dot_general,
        # then agg = rsqrt(z) * agg_block  (== sum_e sqrt(w_e / z_dst) * v_e)
        stacked = jnp.concatenate([w, jnp.sqrt(w) * v], axis=-1)         # (E, 1+C)
        snode = lax.dot_general(dst_oh, stacked, scatter_dims,
                                preferred_element_type=f32)              # (N, 1+C)
        z = snode[:, :1]                                                 # (N, 1)
        agg = snode[:, 1:] * lax.rsqrt(jnp.maximum(z, 1e-30))            # (N, C)

        x = agg + sc

    out_ref[...] = x


def interaction_layer(node_feature, node_attr, edge_src, edge_dst, edge_vec,
                      bessel_w, packed_params):
    N = node_feature.shape[0]
    E = edge_src.shape[0]
    src = edge_src.astype(jnp.int32).reshape(E, 1)          # tiny int32 inputs;
    dst = edge_dst.astype(jnp.int32).reshape(E, 1)          # one-hots built in-kernel

    args = [edge_vec, bessel_w, node_feature, node_attr, src, dst]
    for p in packed_params:
        args += [p["wnode"], p["wkv"], p["fch0"], p["fchh"], p["fco"]]

    return pl.pallas_call(
        _fused_kernel,
        grid=(1,),
        in_specs=[_full_spec(a.shape) for a in args],
        out_specs=_full_spec((N, C_FEAT)),
        out_shape=jax.ShapeDtypeStruct((N, C_FEAT), jnp.float32),
        compiler_params=pltpu.CompilerParams(
            dimension_semantics=("arbitrary",),
            vmem_limit_bytes=32 * 1024 * 1024),   # budgeted for v7x's 64 MiB VMEM
    )(*args)


# ---------------------------------------------------------------- params
def init_params(key):
    """Logical (unpacked) parameters, same layout as the reference module."""
    def lin(k, shape, fan_in):
        return jax.random.normal(k, shape, jnp.float32) / math.sqrt(fan_in)

    params = []
    for _ in range(N_LAYERS):
        key, *ks = jax.random.split(key, 9)
        params.append(dict(
            wq=lin(ks[0], (C_FEAT, D_QK), C_FEAT),
            wk=lin(ks[1], (SH_DIM, C_FEAT, D_QK), C_FEAT * SH_DIM),
            wv=lin(ks[2], (SH_DIM, C_FEAT, C_FEAT), C_FEAT * SH_DIM),
            wself=lin(ks[3], (C_ATTR, C_FEAT, C_FEAT), C_FEAT * C_ATTR),
            fckh=lin(ks[4], (INV_LAYERS, NUM_BASIS, INV_NEURONS), NUM_BASIS),
            fcko=lin(ks[5], (INV_NEURONS, D_QK), INV_NEURONS),
            fcvh=lin(ks[6], (INV_LAYERS, NUM_BASIS, INV_NEURONS), NUM_BASIS),
            fcvo=lin(ks[7], (INV_NEURONS, C_FEAT), INV_NEURONS),
        ))
    return params


def _block_diag(a, b):
    za = jnp.zeros((a.shape[0], b.shape[1]), jnp.float32)
    zb = jnp.zeros((b.shape[0], a.shape[1]), jnp.float32)
    return jnp.concatenate(
        [jnp.concatenate([a, za], axis=1),
         jnp.concatenate([zb, b], axis=1)], axis=0)


def pack_params(params):
    """Fold SH constants / ordering into wk+wv, merge wq with the per-attr
    self-connection into one block weight, and merge the rk/rv radial MLPs
    into one block-diagonal MLP.  Numerically identical to the unpacked
    formulation."""
    sqrt3 = math.sqrt(3.0)
    packed = []
    for p in params:
        wk, wv = p["wk"], p["wv"]
        # xsh channel order in-kernel: [1, ux, uy, uz]; e3nn SH order: [1, y, z, x]*sqrt3
        wk_p = jnp.concatenate([wk[0], sqrt3 * wk[3], sqrt3 * wk[1], sqrt3 * wk[2]], axis=0)
        wv_p = jnp.concatenate([wv[0], sqrt3 * wv[3], sqrt3 * wv[1], sqrt3 * wv[2]], axis=0)
        wkv = jnp.concatenate([wk_p, wv_p], axis=1)                       # (4C, Dq+C)
        wself = jnp.concatenate([p["wself"][b] for b in range(C_ATTR)],
                                axis=0)                                   # (A*C, C)
        wnode = _block_diag(p["wq"], wself)                               # (C+A*C, Dq+C)
        fch0 = jnp.concatenate([p["fckh"][0], p["fcvh"][0]], axis=1)      # (NB, 2H)
        fchh = jnp.stack([_block_diag(p["fckh"][j], p["fcvh"][j])
                          for j in range(1, INV_LAYERS)], axis=0)         # (L-1, 2H, 2H)
        fco = _block_diag(p["fcko"], p["fcvo"])                           # (2H, Dq+C)
        packed.append(dict(wnode=wnode, wkv=wkv,
                           fch0=fch0, fchh=fchh, fco=fco))
    return packed


# ---------------------------------------------------------------- driver
if __name__ == "__main__":
    key = jax.random.PRNGKey(0)
    k1, k2, k3, k4, k5, k6 = jax.random.split(key, 6)

    node_feature = jax.random.normal(k1, (N_NODES, C_FEAT), jnp.float32)
    node_attr = jax.random.normal(k2, (N_NODES, C_ATTR), jnp.float32)
    edge_src = jax.random.randint(k3, (N_EDGES,), 0, N_NODES)
    edge_dst = jax.random.randint(k4, (N_EDGES,), 0, N_NODES)
    # edge vectors with norm strictly inside (0, r_max)
    edge_vec = jax.random.uniform(k5, (N_EDGES, 3), jnp.float32,
                                  minval=0.2, maxval=1.5)

    # trainable Bessel weights, initialized to pi * [1 .. num_basis]
    bessel_w = (math.pi * jnp.arange(1, NUM_BASIS + 1, dtype=jnp.float32)
                ).reshape(1, NUM_BASIS)

    packed_params = pack_params(init_params(k6))

    out = interaction_layer(node_feature, node_attr, edge_src, edge_dst,
                            edge_vec, bessel_w, packed_params)
    out = jax.block_until_ready(out)
    assert out.shape == (N_NODES, C_FEAT)
    assert bool(jnp.all(jnp.isfinite(out)))
    print("KERNEL_OK")
</pallas_src>

<mosaic_0001>
module attributes {stable_mosaic.version = 11 : i64} {
  func.func @_fused_kernel(%arg0: i32, %arg1: memref<32x3xf32, #tpu.memory_space<vmem>>, %arg2: memref<1x8xf32, #tpu.memory_space<vmem>>, %arg3: memref<8x16xf32, #tpu.memory_space<vmem>>, %arg4: memref<8x4xf32, #tpu.memory_space<vmem>>, %arg5: memref<32x1xi32, #tpu.memory_space<vmem>>, %arg6: memref<32x1xi32, #tpu.memory_space<vmem>>, %arg7: memref<80x32xf32, #tpu.memory_space<vmem>>, %arg8: memref<64x32xf32, #tpu.memory_space<vmem>>, %arg9: memref<8x16xf32, #tpu.memory_space<vmem>>, %arg10: memref<2x16x16xf32, #tpu.memory_space<vmem>>, %arg11: memref<16x32xf32, #tpu.memory_space<vmem>>, %arg12: memref<80x32xf32, #tpu.memory_space<vmem>>, %arg13: memref<64x32xf32, #tpu.memory_space<vmem>>, %arg14: memref<8x16xf32, #tpu.memory_space<vmem>>, %arg15: memref<2x16x16xf32, #tpu.memory_space<vmem>>, %arg16: memref<16x32xf32, #tpu.memory_space<vmem>>, %arg17: memref<8x16xf32, #tpu.memory_space<vmem>>) attributes {dimension_semantics = [#tpu.dimension_semantics<arbitrary>], iteration_bounds = array<i64: 1>, scalar_prefetch = 0 : i64, scratch_operands = 0 : i64, tpu.core_type = #tpu.core_type<tc>, window_params = [{pipeline_mode = #tpu.pipeline_mode<synchronous>, transform_indices = @transform_0, window_bounds = array<i64: 32, 3>}, {pipeline_mode = #tpu.pipeline_mode<synchronous>, transform_indices = @transform_1, window_bounds = array<i64: 1, 8>}, {pipeline_mode = #tpu.pipeline_mode<synchronous>, transform_indices = @transform_2, window_bounds = array<i64: 8, 16>}, {pipeline_mode = #tpu.pipeline_mode<synchronous>, transform_indices = @transform_3, window_bounds = array<i64: 8, 4>}, {pipeline_mode = #tpu.pipeline_mode<synchronous>, transform_indices = @transform_4, window_bounds = array<i64: 32, 1>}, {pipeline_mode = #tpu.pipeline_mode<synchronous>, transform_indices = @transform_5, window_bounds = array<i64: 32, 1>}, {pipeline_mode = #tpu.pipeline_mode<synchronous>, transform_indices = @transform_6, window_bounds = array<i64: 80, 32>}, {pipeline_mode = #tpu.pipeline_mode<synchronous>, transform_indices = @transform_7, window_bounds = array<i64: 64, 32>}, {pipeline_mode = #tpu.pipeline_mode<synchronous>, transform_indices = @transform_8, window_bounds = array<i64: 8, 16>}, {pipeline_mode = #tpu.pipeline_mode<synchronous>, transform_indices = @transform_9, window_bounds = array<i64: 2, 16, 16>}, {pipeline_mode = #tpu.pipeline_mode<synchronous>, transform_indices = @transform_10, window_bounds = array<i64: 16, 32>}, {pipeline_mode = #tpu.pipeline_mode<synchronous>, transform_indices = @transform_11, window_bounds = array<i64: 80, 32>}, {pipeline_mode = #tpu.pipeline_mode<synchronous>, transform_indices = @transform_12, window_bounds = array<i64: 64, 32>}, {pipeline_mode = #tpu.pipeline_mode<synchronous>, transform_indices = @transform_13, window_bounds = array<i64: 8, 16>}, {pipeline_mode = #tpu.pipeline_mode<synchronous>, transform_indices = @transform_14, window_bounds = array<i64: 2, 16, 16>}, {pipeline_mode = #tpu.pipeline_mode<synchronous>, transform_indices = @transform_15, window_bounds = array<i64: 16, 32>}, {pipeline_mode = #tpu.pipeline_mode<synchronous>, transform_indices = @transform_16, window_bounds = array<i64: 8, 16>}]} {
    %c0 = arith.constant 0 : index
    %c0_0 = arith.constant 0 : index
    %0 = vector.load %arg1[%c0, %c0_0] : memref<32x3xf32, #tpu.memory_space<vmem>>, vector<32x3xf32>
    %1 = arith.mulf %0, %0 : vector<32x3xf32>
    %cst = arith.constant dense<0.000000e+00> : vector<32xf32>
    %2 = vector.multi_reduction <add>, %1, %cst [1] : vector<32x3xf32> to vector<32xf32>
    %3 = vector.shape_cast %2 : vector<32xf32> to vector<32x1xf32>
    %4 = math.sqrt %3 : vector<32x1xf32>
    %cst_1 = arith.constant 9.99999996E-13 : f32
    %5 = vector.broadcast %cst_1 : f32 to vector<32x1xf32>
    %6 = arith.maximumf %4, %5 : vector<32x1xf32>
    %7 = tpu.reciprocal %6 : vector<32x1xf32> -> vector<32x1xf32>
    %c0_2 = arith.constant 0 : index
    %c0_3 = arith.constant 0 : index
    %8 = vector.load %arg2[%c0_2, %c0_3] : memref<1x8xf32, #tpu.memory_space<vmem>>, vector<1x8xf32>
    %cst_4 = arith.constant 2.500000e-01 : f32
    %9 = vector.broadcast %cst_4 : f32 to vector<32x1xf32>
    %10 = arith.mulf %4, %9 : vector<32x1xf32>
    %11 = vector.broadcast %8 : vector<1x8xf32> to vector<32x8xf32>
    %12 = vector.broadcast %10 : vector<32x1xf32> to vector<32x8xf32>
    %13 = arith.mulf %11, %12 : vector<32x8xf32>
    %14 = math.sin %13 : vector<32x8xf32>
    %cst_5 = arith.constant 5.000000e-01 : f32
    %15 = vector.broadcast %cst_5 : f32 to vector<32x8xf32>
    %16 = arith.mulf %15, %14 : vector<32x8xf32>
    %17 = vector.broadcast %7 : vector<32x1xf32> to vector<32x8xf32>
    %18 = arith.mulf %16, %17 : vector<32x8xf32>
    %cst_6 = arith.constant 2.500000e-01 : f32
    %19 = vector.broadcast %cst_6 : f32 to vector<32x1xf32>
    %20 = arith.mulf %4, %19 : vector<32x1xf32>
    %21 = arith.mulf %20, %20 : vector<32x1xf32>
    %22 = arith.mulf %21, %21 : vector<32x1xf32>
    %23 = arith.mulf %22, %21 : vector<32x1xf32>
    %24 = arith.mulf %23, %20 : vector<32x1xf32>
    %25 = arith.mulf %24, %20 : vector<32x1xf32>
    %cst_7 = arith.constant 2.800000e+01 : f32
    %26 = vector.broadcast %cst_7 : f32 to vector<32x1xf32>
    %27 = arith.mulf %26, %23 : vector<32x1xf32>
    %cst_8 = arith.constant 1.000000e+00 : f32
    %28 = vector.broadcast %cst_8 : f32 to vector<32x1xf32>
    %29 = arith.subf %28, %27 : vector<32x1xf32>
    %cst_9 = arith.constant 4.800000e+01 : f32
    %30 = vector.broadcast %cst_9 : f32 to vector<32x1xf32>
    %31 = arith.mulf %30, %24 : vector<32x1xf32>
    %32 = arith.addf %29, %31 : vector<32x1xf32>
    %cst_10 = arith.constant 2.100000e+01 : f32
    %33 = vector.broadcast %cst_10 : f32 to vector<32x1xf32>
    %34 = arith.mulf %33, %25 : vector<32x1xf32>
    %35 = arith.subf %32, %34 : vector<32x1xf32>
    %cst_11 = arith.constant 1.000000e+00 : f32
    %36 = vector.broadcast %cst_11 : f32 to vector<32x1xf32>
    %37 = arith.cmpf olt, %20, %36 : vector<32x1xf32>
    %38 = arith.extui %37 : vector<32x1xi1> to vector<32x1xi32>
    %39 = arith.sitofp %38 : vector<32x1xi32> to vector<32x1xf32>
    %40 = arith.mulf %35, %39 : vector<32x1xf32>
    %41 = vector.broadcast %40 : vector<32x1xf32> to vector<32x8xf32>
    %42 = arith.mulf %18, %41 : vector<32x8xf32>
    %43 = vector.broadcast %7 : vector<32x1xf32> to vector<32x3xf32>
    %44 = arith.mulf %0, %43 : vector<32x3xf32>
    %45 = tpu.iota {dimensions = array<i32: 1>} : vector<32x8xi32>
    %c0_12 = arith.constant 0 : index
    %c0_13 = arith.constant 0 : index
    %46 = vector.load %arg5[%c0_12, %c0_13] : memref<32x1xi32, #tpu.memory_space<vmem>>, vector<32x1xi32>
    %47 = vector.broadcast %46 : vector<32x1xi32> to vector<32x8xi32>
    %48 = arith.cmpi eq, %45, %47 : vector<32x8xi32>
    %c0_14 = arith.constant 0 : index
    %c0_15 = arith.constant 0 : index
    %49 = vector.load %arg6[%c0_14, %c0_15] : memref<32x1xi32, #tpu.memory_space<vmem>>, vector<32x1xi32>
    %50 = vector.broadcast %49 : vector<32x1xi32> to vector<32x8xi32>
    %51 = arith.cmpi eq, %45, %50 : vector<32x8xi32>
    %52 = arith.extui %48 : vector<32x8xi1> to vector<32x8xi32>
    %53 = arith.sitofp %52 : vector<32x8xi32> to vector<32x8xf32>
    %54 = arith.extui %51 : vector<32x8xi1> to vector<32x8xi32>
    %55 = arith.sitofp %54 : vector<32x8xi32> to vector<32x8xf32>
    %c0_16 = arith.constant 0 : index
    %c0_17 = arith.constant 0 : index
    %56 = vector.load %arg3[%c0_16, %c0_17] : memref<8x16xf32, #tpu.memory_space<vmem>>, vector<8x16xf32>
    %c0_18 = arith.constant 0 : index
    %c0_19 = arith.constant 0 : index
    %57 = vector.load %arg4[%c0_18, %c0_19] : memref<8x4xf32, #tpu.memory_space<vmem>>, vector<8x4xf32>
    %58 = vector.extract_strided_slice %44 {offsets = [0, 0], sizes = [32, 1], strides = [1, 1]} : vector<32x3xf32> to vector<32x1xf32>
    %59 = vector.shape_cast %58 : vector<32x1xf32> to vector<32x1xf32>
    %60 = vector.broadcast %59 : vector<32x1xf32> to vector<32x16xf32>
    %61 = vector.extract_strided_slice %44 {offsets = [0, 1], sizes = [32, 1], strides = [1, 1]} : vector<32x3xf32> to vector<32x1xf32>
    %62 = vector.shape_cast %61 : vector<32x1xf32> to vector<32x1xf32>
    %63 = vector.broadcast %62 : vector<32x1xf32> to vector<32x16xf32>
    %64 = vector.extract_strided_slice %44 {offsets = [0, 2], sizes = [32, 1], strides = [1, 1]} : vector<32x3xf32> to vector<32x1xf32>
    %65 = vector.shape_cast %64 : vector<32x1xf32> to vector<32x1xf32>
    %66 = vector.broadcast %65 : vector<32x1xf32> to vector<32x16xf32>
    %67 = vector.extract_strided_slice %57 {offsets = [0, 0], sizes = [8, 1], strides = [1, 1]} : vector<8x4xf32> to vector<8x1xf32>
    %68 = vector.shape_cast %67 : vector<8x1xf32> to vector<8x1xf32>
    %69 = vector.broadcast %68 : vector<8x1xf32> to vector<8x16xf32>
    %70 = vector.extract_strided_slice %57 {offsets = [0, 1], sizes = [8, 1], strides = [1, 1]} : vector<8x4xf32> to vector<8x1xf32>
    %71 = vector.shape_cast %70 : vector<8x1xf32> to vector<8x1xf32>
    %72 = vector.broadcast %71 : vector<8x1xf32> to vector<8x16xf32>
    %73 = vector.extract_strided_slice %57 {offsets = [0, 2], sizes = [8, 1], strides = [1, 1]} : vector<8x4xf32> to vector<8x1xf32>
    %74 = vector.shape_cast %73 : vector<8x1xf32> to vector<8x1xf32>
    %75 = vector.broadcast %74 : vector<8x1xf32> to vector<8x16xf32>
    %76 = vector.extract_strided_slice %57 {offsets = [0, 3], sizes = [8, 1], strides = [1, 1]} : vector<8x4xf32> to vector<8x1xf32>
    %77 = vector.shape_cast %76 : vector<8x1xf32> to vector<8x1xf32>
    %78 = vector.broadcast %77 : vector<8x1xf32> to vector<8x16xf32>
    %79 = arith.mulf %56, %69 : vector<8x16xf32>
    %80 = arith.mulf %56, %72 : vector<8x16xf32>
    %81 = arith.mulf %56, %75 : vector<8x16xf32>
    %82 = arith.mulf %56, %78 : vector<8x16xf32>
    %83 = tpu.concatenate %56, %79, %80, %81, %82 in 1 : vector<8x16xf32>, vector<8x16xf32>, vector<8x16xf32>, vector<8x16xf32>, vector<8x16xf32> -> vector<8x80xf32>
    %c0_20 = arith.constant 0 : index
    %c0_21 = arith.constant 0 : index
    %84 = vector.load %arg7[%c0_20, %c0_21] : memref<80x32xf32, #tpu.memory_space<vmem>>, vector<80x32xf32>
    %cst_22 = arith.constant dense<0.000000e+00> : vector<8x32xf32>
    %85 = tpu.matmul %83, %84, %cst_22 {dimension_numbers = #tpu.dot_dimension_numbers<[1], [0], [0], [1], [0, 0, 1, 1], [], []>} : vector<8x80xf32>, vector<80x32xf32>, vector<8x32xf32> -> vector<8x32xf32>
    %86 = vector.extract_strided_slice %85 {offsets = [0, 0], sizes = [8, 16], strides = [1, 1]} : vector<8x32xf32> to vector<8x16xf32>
    %87 = vector.extract_strided_slice %85 {offsets = [0, 16], sizes = [8, 16], strides = [1, 1]} : vector<8x32xf32> to vector<8x16xf32>
    %cst_23 = arith.constant dense<0.000000e+00> : vector<32x16xf32>
    %88 = tpu.matmul %53, %56, %cst_23 {dimension_numbers = #tpu.dot_dimension_numbers<[1], [0], [0], [1], [0, 0, 1, 1], [], []>} : vector<32x8xf32>, vector<8x16xf32>, vector<32x16xf32> -> vector<32x16xf32>
    %cst_24 = arith.constant dense<0.000000e+00> : vector<32x16xf32>
    %89 = tpu.matmul %55, %86, %cst_24 {dimension_numbers = #tpu.dot_dimension_numbers<[1], [0], [0], [1], [0, 0, 1, 1], [], []>} : vector<32x8xf32>, vector<8x16xf32>, vector<32x16xf32> -> vector<32x16xf32>
    %c0_25 = arith.constant 0 : index
    %c0_26 = arith.constant 0 : index
    %90 = vector.load %arg9[%c0_25, %c0_26] : memref<8x16xf32, #tpu.memory_space<vmem>>, vector<8x16xf32>
    %cst_27 = arith.constant dense<0.000000e+00> : vector<32x16xf32>
    %91 = tpu.matmul %42, %90, %cst_27 {dimension_numbers = #tpu.dot_dimension_numbers<[1], [0], [0], [1], [0, 0, 1, 1], [], []>} : vector<32x8xf32>, vector<8x16xf32>, vector<32x16xf32> -> vector<32x16xf32>
    %92 = arith.negf %91 : vector<32x16xf32>
    %93 = math.exp %92 : vector<32x16xf32>
    %cst_28 = arith.constant 1.000000e+00 : f32
    %94 = vector.broadcast %cst_28 : f32 to vector<32x16xf32>
    %95 = arith.addf %94, %93 : vector<32x16xf32>
    %96 = arith.divf %94, %95 : vector<32x16xf32>
    %97 = arith.mulf %91, %96 : vector<32x16xf32>
    %c0_29 = arith.constant 0 : index
    %c0_30 = arith.constant 0 : index
    %c0_31 = arith.constant 0 : index
    %98 = vector.load %arg10[%c0_29, %c0_30, %c0_31] : memref<2x16x16xf32, #tpu.memory_space<vmem>>, vector<1x16x16xf32>
    %99 = vector.shape_cast %98 : vector<1x16x16xf32> to vector<16x16xf32>
    %cst_32 = arith.constant dense<0.000000e+00> : vector<32x16xf32>
    %100 = tpu.matmul %97, %99, %cst_32 {dimension_numbers = #tpu.dot_dimension_numbers<[1], [0], [0], [1], [0, 0, 1, 1], [], []>} : vector<32x16xf32>, vector<16x16xf32>, vector<32x16xf32> -> vector<32x16xf32>
    %101 = arith.negf %100 : vector<32x16xf32>
    %102 = math.exp %101 : vector<32x16xf32>
    %cst_33 = arith.constant 1.000000e+00 : f32
    %103 = vector.broadcast %cst_33 : f32 to vector<32x16xf32>
    %104 = arith.addf %103, %102 : vector<32x16xf32>
    %105 = arith.divf %103, %104 : vector<32x16xf32>
    %106 = arith.mulf %100, %105 : vector<32x16xf32>
    %c1 = arith.constant 1 : index
    %c0_34 = arith.constant 0 : index
    %c0_35 = arith.constant 0 : index
    %107 = vector.load %arg10[%c1, %c0_34, %c0_35] : memref<2x16x16xf32, #tpu.memory_space<vmem>>, vector<1x16x16xf32>
    %108 = vector.shape_cast %107 : vector<1x16x16xf32> to vector<16x16xf32>
    %cst_36 = arith.constant dense<0.000000e+00> : vector<32x16xf32>
    %109 = tpu.matmul %106, %108, %cst_36 {dimension_numbers = #tpu.dot_dimension_numbers<[1], [0], [0], [1], [0, 0, 1, 1], [], []>} : vector<32x16xf32>, vector<16x16xf32>, vector<32x16xf32> -> vector<32x16xf32>
    %110 = arith.negf %109 : vector<32x16xf32>
    %111 = math.exp %110 : vector<32x16xf32>
    %cst_37 = arith.constant 1.000000e+00 : f32
    %112 = vector.broadcast %cst_37 : f32 to vector<32x16xf32>
    %113 = arith.addf %112, %111 : vector<32x16xf32>
    %114 = arith.divf %112, %113 : vector<32x16xf32>
    %115 = arith.mulf %109, %114 : vector<32x16xf32>
    %c0_38 = arith.constant 0 : index
    %c0_39 = arith.constant 0 : index
    %116 = vector.load %arg11[%c0_38, %c0_39] : memref<16x32xf32, #tpu.memory_space<vmem>>, vector<16x32xf32>
    %cst_40 = arith.constant dense<0.000000e+00> : vector<32x32xf32>
    %117 = tpu.matmul %115, %116, %cst_40 {dimension_numbers = #tpu.dot_dimension_numbers<[1], [0], [0], [1], [0, 0, 1, 1], [], []>} : vector<32x16xf32>, vector<16x32xf32>, vector<32x32xf32> -> vector<32x32xf32>
    %118 = arith.mulf %88, %60 : vector<32x16xf32>
    %119 = arith.mulf %88, %63 : vector<32x16xf32>
    %120 = arith.mulf %88, %66 : vector<32x16xf32>
    %121 = tpu.concatenate %88, %118, %119, %120 in 1 : vector<32x16xf32>, vector<32x16xf32>, vector<32x16xf32>, vector<32x16xf32> -> vector<32x64xf32>
    %c0_41 = arith.constant 0 : index
    %c0_42 = arith.constant 0 : index
    %122 = vector.load %arg8[%c0_41, %c0_42] : memref<64x32xf32, #tpu.memory_space<vmem>>, vector<64x32xf32>
    %cst_43 = arith.constant dense<0.000000e+00> : vector<32x32xf32>
    %123 = tpu.matmul %121, %122, %cst_43 {dimension_numbers = #tpu.dot_dimension_numbers<[1], [0], [0], [1], [0, 0, 1, 1], [], []>} : vector<32x64xf32>, vector<64x32xf32>, vector<32x32xf32> -> vector<32x32xf32>
    %124 = arith.mulf %123, %117 : vector<32x32xf32>
    %125 = vector.extract_strided_slice %124 {offsets = [0, 0], sizes = [32, 16], strides = [1, 1]} : vector<32x32xf32> to vector<32x16xf32>
    %126 = vector.extract_strided_slice %124 {offsets = [0, 16], sizes = [32, 16], strides = [1, 1]} : vector<32x32xf32> to vector<32x16xf32>
    %127 = arith.mulf %89, %125 : vector<32x16xf32>
    %cst_44 = arith.constant dense<0.000000e+00> : vector<32xf32>
    %128 = vector.multi_reduction <add>, %127, %cst_44 [1] : vector<32x16xf32> to vector<32xf32>
    %129 = vector.shape_cast %128 : vector<32xf32> to vector<32x1xf32>
    %cst_45 = arith.constant -1.000000e+30 : f32
    %130 = vector.shape_cast %129 : vector<32x1xf32> to vector<32x1xf32>
    %131 = vector.broadcast %130 : vector<32x1xf32> to vector<32x8xf32>
    %132 = vector.broadcast %cst_45 : f32 to vector<32x8xf32>
    %133 = arith.select %51, %131, %132 : vector<32x8xi1>, vector<32x8xf32>
    %cst_46 = arith.constant dense<0xFF800000> : vector<8xf32>
    %134 = vector.multi_reduction <maximumf>, %133, %cst_46 [0] : vector<32x8xf32> to vector<8xf32>
    %135 = vector.shape_cast %134 : vector<8xf32> to vector<1x8xf32>
    %136 = vector.broadcast %135 : vector<1x8xf32> to vector<32x8xf32>
    %137 = arith.mulf %55, %136 : vector<32x8xf32>
    %cst_47 = arith.constant dense<0.000000e+00> : vector<32xf32>
    %138 = vector.multi_reduction <add>, %137, %cst_47 [1] : vector<32x8xf32> to vector<32xf32>
    %139 = vector.shape_cast %138 : vector<32xf32> to vector<32x1xf32>
    %140 = arith.subf %129, %139 : vector<32x1xf32>
    %141 = math.exp %140 : vector<32x1xf32>
    %142 = arith.mulf %141, %40 : vector<32x1xf32>
    %143 = math.sqrt %142 : vector<32x1xf32>
    %144 = vector.broadcast %143 : vector<32x1xf32> to vector<32x16xf32>
    %145 = arith.mulf %144, %126 : vector<32x16xf32>
    %146 = tpu.concatenate %142, %145 in 1 : vector<32x1xf32>, vector<32x16xf32> -> vector<32x17xf32>
    %cst_48 = arith.constant dense<0.000000e+00> : vector<8x17xf32>
    %147 = tpu.matmul %55, %146, %cst_48 {dimension_numbers = #tpu.dot_dimension_numbers<[0], [0], [1], [1], [0, 1, 1, 1], [], []>} : vector<32x8xf32>, vector<32x17xf32>, vector<8x17xf32> -> vector<8x17xf32>
    %148 = vector.extract_strided_slice %147 {offsets = [0, 0], sizes = [8, 1], strides = [1, 1]} : vector<8x17xf32> to vector<8x1xf32>
    %149 = vector.extract_strided_slice %147 {offsets = [0, 1], sizes = [8, 16], strides = [1, 1]} : vector<8x17xf32> to vector<8x16xf32>
    %cst_49 = arith.constant 1.000000e-30 : f32
    %150 = vector.broadcast %cst_49 : f32 to vector<8x1xf32>
    %151 = arith.maximumf %148, %150 : vector<8x1xf32>
    %152 = math.rsqrt %151 : vector<8x1xf32>
    %153 = vector.broadcast %152 : vector<8x1xf32> to vector<8x16xf32>
    %154 = arith.mulf %149, %153 : vector<8x16xf32>
    %155 = arith.addf %154, %87 : vector<8x16xf32>
    %156 = arith.mulf %155, %69 : vector<8x16xf32>
    %157 = arith.mulf %155, %72 : vector<8x16xf32>
    %158 = arith.mulf %155, %75 : vector<8x16xf32>
    %159 = arith.mulf %155, %78 : vector<8x16xf32>
    %160 = tpu.concatenate %155, %156, %157, %158, %159 in 1 : vector<8x16xf32>, vector<8x16xf32>, vector<8x16xf32>, vector<8x16xf32>, vector<8x16xf32> -> vector<8x80xf32>
    %c0_50 = arith.constant 0 : index
    %c0_51 = arith.constant 0 : index
    %161 = vector.load %arg12[%c0_50, %c0_51] : memref<80x32xf32, #tpu.memory_space<vmem>>, vector<80x32xf32>
    %cst_52 = arith.constant dense<0.000000e+00> : vector<8x32xf32>
    %162 = tpu.matmul %160, %161, %cst_52 {dimension_numbers = #tpu.dot_dimension_numbers<[1], [0], [0], [1], [0, 0, 1, 1], [], []>} : vector<8x80xf32>, vector<80x32xf32>, vector<8x32xf32> -> vector<8x32xf32>
    %163 = vector.extract_strided_slice %162 {offsets = [0, 0], sizes = [8, 16], strides = [1, 1]} : vector<8x32xf32> to vector<8x16xf32>
    %164 = vector.extract_strided_slice %162 {offsets = [0, 16], sizes = [8, 16], strides = [1, 1]} : vector<8x32xf32> to vector<8x16xf32>
    %cst_53 = arith.constant dense<0.000000e+00> : vector<32x16xf32>
    %165 = tpu.matmul %53, %155, %cst_53 {dimension_numbers = #tpu.dot_dimension_numbers<[1], [0], [0], [1], [0, 0, 1, 1], [], []>} : vector<32x8xf32>, vector<8x16xf32>, vector<32x16xf32> -> vector<32x16xf32>
    %cst_54 = arith.constant dense<0.000000e+00> : vector<32x16xf32>
    %166 = tpu.matmul %55, %163, %cst_54 {dimension_numbers = #tpu.dot_dimension_numbers<[1], [0], [0], [1], [0, 0, 1, 1], [], []>} : vector<32x8xf32>, vector<8x16xf32>, vector<32x16xf32> -> vector<32x16xf32>
    %c0_55 = arith.constant 0 : index
    %c0_56 = arith.constant 0 : index
    %167 = vector.load %arg14[%c0_55, %c0_56] : memref<8x16xf32, #tpu.memory_space<vmem>>, vector<8x16xf32>
    %cst_57 = arith.constant dense<0.000000e+00> : vector<32x16xf32>
    %168 = tpu.matmul %42, %167, %cst_57 {dimension_numbers = #tpu.dot_dimension_numbers<[1], [0], [0], [1], [0, 0, 1, 1], [], []>} : vector<32x8xf32>, vector<8x16xf32>, vector<32x16xf32> -> vector<32x16xf32>
    %169 = arith.negf %168 : vector<32x16xf32>
    %170 = math.exp %169 : vector<32x16xf32>
    %cst_58 = arith.constant 1.000000e+00 : f32
    %171 = vector.broadcast %cst_58 : f32 to vector<32x16xf32>
    %172 = arith.addf %171, %170 : vector<32x16xf32>
    %173 = arith.divf %171, %172 : vector<32x16xf32>
    %174 = arith.mulf %168, %173 : vector<32x16xf32>
    %c0_59 = arith.constant 0 : index
    %c0_60 = arith.constant 0 : index
    %c0_61 = arith.constant 0 : index
    %175 = vector.load %arg15[%c0_59, %c0_60, %c0_61] : memref<2x16x16xf32, #tpu.memory_space<vmem>>, vector<1x16x16xf32>
    %176 = vector.shape_cast %175 : vector<1x16x16xf32> to vector<16x16xf32>
    %cst_62 = arith.constant dense<0.000000e+00> : vector<32x16xf32>
    %177 = tpu.matmul %174, %176, %cst_62 {dimension_numbers = #tpu.dot_dimension_numbers<[1], [0], [0], [1], [0, 0, 1, 1], [], []>} : vector<32x16xf32>, vector<16x16xf32>, vector<32x16xf32> -> vector<32x16xf32>
    %178 = arith.negf %177 : vector<32x16xf32>
    %179 = math.exp %178 : vector<32x16xf32>
    %cst_63 = arith.constant 1.000000e+00 : f32
    %180 = vector.broadcast %cst_63 : f32 to vector<32x16xf32>
    %181 = arith.addf %180, %179 : vector<32x16xf32>
    %182 = arith.divf %180, %181 : vector<32x16xf32>
    %183 = arith.mulf %177, %182 : vector<32x16xf32>
    %c1_64 = arith.constant 1 : index
    %c0_65 = arith.constant 0 : index
    %c0_66 = arith.constant 0 : index
    %184 = vector.load %arg15[%c1_64, %c0_65, %c0_66] : memref<2x16x16xf32, #tpu.memory_space<vmem>>, vector<1x16x16xf32>
    %185 = vector.shape_cast %184 : vector<1x16x16xf32> to vector<16x16xf32>
    %cst_67 = arith.constant dense<0.000000e+00> : vector<32x16xf32>
    %186 = tpu.matmul %183, %185, %cst_67 {dimension_numbers = #tpu.dot_dimension_numbers<[1], [0], [0], [1], [0, 0, 1, 1], [], []>} : vector<32x16xf32>, vector<16x16xf32>, vector<32x16xf32> -> vector<32x16xf32>
    %187 = arith.negf %186 : vector<32x16xf32>
    %188 = math.exp %187 : vector<32x16xf32>
    %cst_68 = arith.constant 1.000000e+00 : f32
    %189 = vector.broadcast %cst_68 : f32 to vector<32x16xf32>
    %190 = arith.addf %189, %188 : vector<32x16xf32>
    %191 = arith.divf %189, %190 : vector<32x16xf32>
    %192 = arith.mulf %186, %191 : vector<32x16xf32>
    %c0_69 = arith.constant 0 : index
    %c0_70 = arith.constant 0 : index
    %193 = vector.load %arg16[%c0_69, %c0_70] : memref<16x32xf32, #tpu.memory_space<vmem>>, vector<16x32xf32>
    %cst_71 = arith.constant dense<0.000000e+00> : vector<32x32xf32>
    %194 = tpu.matmul %192, %193, %cst_71 {dimension_numbers = #tpu.dot_dimension_numbers<[1], [0], [0], [1], [0, 0, 1, 1], [], []>} : vector<32x16xf32>, vector<16x32xf32>, vector<32x32xf32> -> vector<32x32xf32>
    %195 = arith.mulf %165, %60 : vector<32x16xf32>
    %196 = arith.mulf %165, %63 : vector<32x16xf32>
    %197 = arith.mulf %165, %66 : vector<32x16xf32>
    %198 = tpu.concatenate %165, %195, %196, %197 in 1 : vector<32x16xf32>, vector<32x16xf32>, vector<32x16xf32>, vector<32x16xf32> -> vector<32x64xf32>
    %c0_72 = arith.constant 0 : index
    %c0_73 = arith.constant 0 : index
    %199 = vector.load %arg13[%c0_72, %c0_73] : memref<64x32xf32, #tpu.memory_space<vmem>>, vector<64x32xf32>
    %cst_74 = arith.constant dense<0.000000e+00> : vector<32x32xf32>
    %200 = tpu.matmul %198, %199, %cst_74 {dimension_numbers = #tpu.dot_dimension_numbers<[1], [0], [0], [1], [0, 0, 1, 1], [], []>} : vector<32x64xf32>, vector<64x32xf32>, vector<32x32xf32> -> vector<32x32xf32>
    %201 = arith.mulf %200, %194 : vector<32x32xf32>
    %202 = vector.extract_strided_slice %201 {offsets = [0, 0], sizes = [32, 16], strides = [1, 1]} : vector<32x32xf32> to vector<32x16xf32>
    %203 = vector.extract_strided_slice %201 {offsets = [0, 16], sizes = [32, 16], strides = [1, 1]} : vector<32x32xf32> to vector<32x16xf32>
    %204 = arith.mulf %166, %202 : vector<32x16xf32>
    %cst_75 = arith.constant dense<0.000000e+00> : vector<32xf32>
    %205 = vector.multi_reduction <add>, %204, %cst_75 [1] : vector<32x16xf32> to vector<32xf32>
    %206 = vector.shape_cast %205 : vector<32xf32> to vector<32x1xf32>
    %cst_76 = arith.constant -1.000000e+30 : f32
    %207 = vector.shape_cast %206 : vector<32x1xf32> to vector<32x1xf32>
    %208 = vector.broadcast %207 : vector<32x1xf32> to vector<32x8xf32>
    %209 = vector.broadcast %cst_76 : f32 to vector<32x8xf32>
    %210 = arith.select %51, %208, %209 : vector<32x8xi1>, vector<32x8xf32>
    %cst_77 = arith.constant dense<0xFF800000> : vector<8xf32>
    %211 = vector.multi_reduction <maximumf>, %210, %cst_77 [0] : vector<32x8xf32> to vector<8xf32>
    %212 = vector.shape_cast %211 : vector<8xf32> to vector<1x8xf32>
    %213 = vector.broadcast %212 : vector<1x8xf32> to vector<32x8xf32>
    %214 = arith.mulf %55, %213 : vector<32x8xf32>
    %cst_78 = arith.constant dense<0.000000e+00> : vector<32xf32>
    %215 = vector.multi_reduction <add>, %214, %cst_78 [1] : vector<32x8xf32> to vector<32xf32>
    %216 = vector.shape_cast %215 : vector<32xf32> to vector<32x1xf32>
    %217 = arith.subf %206, %216 : vector<32x1xf32>
    %218 = math.exp %217 : vector<32x1xf32>
    %219 = arith.mulf %218, %40 : vector<32x1xf32>
    %220 = math.sqrt %219 : vector<32x1xf32>
    %221 = vector.broadcast %220 : vector<32x1xf32> to vector<32x16xf32>
    %222 = arith.mulf %221, %203 : vector<32x16xf32>
    %223 = tpu.concatenate %219, %222 in 1 : vector<32x1xf32>, vector<32x16xf32> -> vector<32x17xf32>
    %cst_79 = arith.constant dense<0.000000e+00> : vector<8x17xf32>
    %224 = tpu.matmul %55, %223, %cst_79 {dimension_numbers = #tpu.dot_dimension_numbers<[0], [0], [1], [1], [0, 1, 1, 1], [], []>} : vector<32x8xf32>, vector<32x17xf32>, vector<8x17xf32> -> vector<8x17xf32>
    %225 = vector.extract_strided_slice %224 {offsets = [0, 0], sizes = [8, 1], strides = [1, 1]} : vector<8x17xf32> to vector<8x1xf32>
    %226 = vector.extract_strided_slice %224 {offsets = [0, 1], sizes = [8, 16], strides = [1, 1]} : vector<8x17xf32> to vector<8x16xf32>
    %cst_80 = arith.constant 1.000000e-30 : f32
    %227 = vector.broadcast %cst_80 : f32 to vector<8x1xf32>
    %228 = arith.maximumf %225, %227 : vector<8x1xf32>
    %229 = math.rsqrt %228 : vector<8x1xf32>
    %230 = vector.broadcast %229 : vector<8x1xf32> to vector<8x16xf32>
    %231 = arith.mulf %226, %230 : vector<8x16xf32>
    %232 = arith.addf %231, %164 : vector<8x16xf32>
    %c0_81 = arith.constant 0 : index
    %c0_82 = arith.constant 0 : index
    %233 = vector.load %arg17[%c0_81, %c0_82] : memref<8x16xf32, #tpu.memory_space<vmem>>, vector<8x16xf32>
    tpu.vector_store %arg17[%c0_81, %c0_82], %232 {strides = array<i32>} : memref<8x16xf32, #tpu.memory_space<vmem>>, vector<8x16xf32>,
    return
  }
  func.func @transform_0(%arg0: i32) -> (i32, i32) {
    %c0_i32 = arith.constant 0 : i32
    %c0_i32_0 = arith.constant 0 : i32
    %c0_i32_1 = arith.constant 0 : i32
    return %c0_i32, %c0_i32_0 : i32, i32
  }
  func.func @transform_1(%arg0: i32) -> (i32, i32) {
    %c0_i32 = arith.constant 0 : i32
    %c0_i32_0 = arith.constant 0 : i32
    %c0_i32_1 = arith.constant 0 : i32
    return %c0_i32, %c0_i32_0 : i32, i32
  }
  func.func @transform_2(%arg0: i32) -> (i32, i32) {
    %c0_i32 = arith.constant 0 : i32
    %c0_i32_0 = arith.constant 0 : i32
    %c0_i32_1 = arith.constant 0 : i32
    return %c0_i32, %c0_i32_0 : i32, i32
  }
  func.func @transform_3(%arg0: i32) -> (i32, i32) {
    %c0_i32 = arith.constant 0 : i32
    %c0_i32_0 = arith.constant 0 : i32
    %c0_i32_1 = arith.constant 0 : i32
    return %c0_i32, %c0_i32_0 : i32, i32
  }
  func.func @transform_4(%arg0: i32) -> (i32, i32) {
    %c0_i32 = arith.constant 0 : i32
    %c0_i32_0 = arith.constant 0 : i32
    %c0_i32_1 = arith.constant 0 : i32
    return %c0_i32, %c0_i32_0 : i32, i32
  }
  func.func @transform_5(%arg0: i32) -> (i32, i32) {
    %c0_i32 = arith.constant 0 : i32
    %c0_i32_0 = arith.constant 0 : i32
    %c0_i32_1 = arith.constant 0 : i32
    return %c0_i32, %c0_i32_0 : i32, i32
  }
  func.func @transform_6(%arg0: i32) -> (i32, i32) {
    %c0_i32 = arith.constant 0 : i32
    %c0_i32_0 = arith.constant 0 : i32
    %c0_i32_1 = arith.constant 0 : i32
    return %c0_i32, %c0_i32_0 : i32, i32
  }
  func.func @transform_7(%arg0: i32) -> (i32, i32) {
    %c0_i32 = arith.constant 0 : i32
    %c0_i32_0 = arith.constant 0 : i32
    %c0_i32_1 = arith.constant 0 : i32
    return %c0_i32, %c0_i32_0 : i32, i32
  }
  func.func @transform_8(%arg0: i32) -> (i32, i32) {
    %c0_i32 = arith.constant 0 : i32
    %c0_i32_0 = arith.constant 0 : i32
    %c0_i32_1 = arith.constant 0 : i32
    return %c0_i32, %c0_i32_0 : i32, i32
  }
  func.func @transform_9(%arg0: i32) -> (i32, i32, i32) {
    %c0_i32 = arith.constant 0 : i32
    %c0_i32_0 = arith.constant 0 : i32
    %c0_i32_1 = arith.constant 0 : i32
    %c0_i32_2 = arith.constant 0 : i32
    return %c0_i32, %c0_i32_0, %c0_i32_1 : i32, i32, i32
  }
  func.func @transform_10(%arg0: i32) -> (i32, i32) {
    %c0_i32 = arith.constant 0 : i32
    %c0_i32_0 = arith.constant 0 : i32
    %c0_i32_1 = arith.constant 0 : i32
    return %c0_i32, %c0_i32_0 : i32, i32
  }
  func.func @transform_11(%arg0: i32) -> (i32, i32) {
    %c0_i32 = arith.constant 0 : i32
    %c0_i32_0 = arith.constant 0 : i32
    %c0_i32_1 = arith.constant 0 : i32
    return %c0_i32, %c0_i32_0 : i32, i32
  }
  func.func @transform_12(%arg0: i32) -> (i32, i32) {
    %c0_i32 = arith.constant 0 : i32
    %c0_i32_0 = arith.constant 0 : i32
    %c0_i32_1 = arith.constant 0 : i32
    return %c0_i32, %c0_i32_0 : i32, i32
  }
  func.func @transform_13(%arg0: i32) -> (i32, i32) {
    %c0_i32 = arith.constant 0 : i32
    %c0_i32_0 = arith.constant 0 : i32
    %c0_i32_1 = arith.constant 0 : i32
    return %c0_i32, %c0_i32_0 : i32, i32
  }
  func.func @transform_14(%arg0: i32) -> (i32, i32, i32) {
    %c0_i32 = arith.constant 0 : i32
    %c0_i32_0 = arith.constant 0 : i32
    %c0_i32_1 = arith.constant 0 : i32
    %c0_i32_2 = arith.constant 0 : i32
    return %c0_i32, %c0_i32_0, %c0_i32_1 : i32, i32, i32
  }
  func.func @transform_15(%arg0: i32) -> (i32, i32) {
    %c0_i32 = arith.constant 0 : i32
    %c0_i32_0 = arith.constant 0 : i32
    %c0_i32_1 = arith.constant 0 : i32
    return %c0_i32, %c0_i32_0 : i32, i32
  }
  func.func @transform_16(%arg0: i32) -> (i32, i32) {
    %c0_i32 = arith.constant 0 : i32
    %c0_i32_0 = arith.constant 0 : i32
    %c0_i32_1 = arith.constant 0 : i32
    return %c0_i32, %c0_i32_0 : i32, i32
  }
}

</mosaic_0001>

<bundles_post_ra>
// kernel: tpu_custom_call.1
= control target key start
LH: loop header
LB: loop body
LE: loop exit
PB: predicated region body
PF: predicated region fallthrough
CT: control target
= control target key end

     0   :  { %s5190_s0 = inlined_call_operand.vmem [shape: f32[32,3], index: 0, kind: input, shape index: {}]   ;;  %s5191_s1 = inlined_call_operand.vmem [shape: f32[1,8], index: 1, kind: input, shape index: {}]   ;;  %s5192_s2 = inlined_call_operand.vmem [shape: f32[8,16], index: 2, kind: input, shape index: {}]   ;;  %s5193_s3 = inlined_call_operand.vmem [shape: f32[8,4], index: 3, kind: input, shape index: {}]   ;;  %s5194_s4 = inlined_call_operand.vmem [shape: s32[32,1], index: 4, kind: input, shape index: {}]   ;;  %s5195_s5 = inlined_call_operand.vmem [shape: s32[32,1], index: 5, kind: input, shape index: {}]   ;;  %s5196_s6 = inlined_call_operand.vmem [shape: f32[80,32], index: 6, kind: input, shape index: {}]   ;;  %s5197_s7 = inlined_call_operand.vmem [shape: f32[64,32], index: 7, kind: input, shape index: {}]   ;;  %s5198_s8 = inlined_call_operand.vmem [shape: f32[8,16], index: 8, kind: input, shape index: {}]   ;;  %s5199_s9 = inlined_call_operand.vmem [shape: f32[2,16,16], index: 9, kind: input, shape index: {}]   ;;  %s5200_s10 = inlined_call_operand.vmem [shape: f32[16,32], index: 10, kind: input, shape index: {}]   ;;  %s5201_s11 = inlined_call_operand.vmem [shape: f32[80,32], index: 11, kind: input, shape index: {}]   ;;  %s5202_s12 = inlined_call_operand.vmem [shape: f32[64,32], index: 12, kind: input, shape index: {}]   ;;  %s5203_s13 = inlined_call_operand.vmem [shape: f32[8,16], index: 13, kind: input, shape index: {}]   ;;  %s5204_s14 = inlined_call_operand.vmem [shape: f32[2,16,16], index: 14, kind: input, shape index: {}]   ;;  %s5205_s15 = inlined_call_operand.vmem [shape: f32[16,32], index: 15, kind: input, shape index: {}]   ;;  %s5206_s16 = inlined_call_operand.hbm [shape: f32[8,16], index: 16, kind: output, shape index: {}]  }
   0x1   :  { %5228 = sst [smem:[#allocation12_spill]] %s5190_s0 }
   0x2   :  { %v677_v0 = vld [vmem:[%s5193_s3] sm:$0xff]  ;;  %v5216_v1 = vmov 0   ;;  %v3922_v2 = vmov 2  }
   0x3   :  { %3697 = vset.pattern.permute.xlu0 %v5216_v1  ;;  %3699 = vset.pattern.permute.xlu1 %v3922_v2 }
   0x4   :  { %21 = vsyncpa [#allocation3], 0  ;;  %732 = vperm.xlu0 %3697, %v677_v0   ;;  %740 = vperm.xlu1 %3699, %v677_v0   ;;  %v4038_v3 = vld [vmem:[%s5192_s2] sm:$0xff]  ;;  %v3923_v4 = vmov 1   ;;  %v3924_v5 = vmov 3   ;;  %v776_v7 = vld [vmem:[%s5196_s6 + $0x8] sm:$0xff]  ;;  %v618_v61 = vlaneseq }
   0x5   :  { %3362 = vmatprep.subr.mxu1 %v4038_v3  ;;  %v775_v6 = vld [vmem:[%s5196_s6] sm:$0xff]  ;;  %v777_v8 = vld [vmem:[%s5196_s6 + $0x10] sm:$0xff]  ;;  %v5208_v9 = vmov 0.0|0.0   ;;  %v778_v11 = vld [vmem:[%s5196_s6 + $0x18] sm:$0xff]  ;;  %vm3926_vm0 = vmmov 0   ;;  %v5210_v22 = vmov 0.0  }
   0x6   :  { %3363 = vmatpush3.msra.mxu1 %v4038_v3  ;;  %3559 = vmatprep.subr.bf16.mxu0 %v5208_v9  ;;  %v3560_v10 = vpack.c.bf16 %v776_v7, %v775_v6  ;;  %v3563_v12 = vpack.c.bf16 %v778_v11, %v777_v8  ;;  %v779_v13 = vld [vmem:[%s5196_s6 + $0x20] sm:$0xff]  ;;  %v780_v14 = vld [vmem:[%s5196_s6 + $0x28] sm:$0xff]  ;;  %v781_v16 = vld [vmem:[%s5196_s6 + $0x30] sm:$0xff]  ;;  %s3928_s26 = smov 16   ;;  %s3930_s27 = smov 32   ;;  %vm62_vm1 = vcmask 23552  }
   0x7   :  { %v3566_v15 = vpack.c.bf16 %v780_v14, %v779_v13  ;;  %v782_v17 = vld [vmem:[%s5196_s6 + $0x38] sm:$0xff]  ;;  %v783_v19 = vld [vmem:[%s5196_s6 + $0x40] sm:$0xff]  ;;  %v784_v20 = vld [vmem:[%s5196_s6 + $0x48] sm:$0xff]  ;;  %3359 = vmatprep.mubr.msk.f32.mxu0 %vm3926_vm0, %v5210_v22  ;;  %s3929_s6 = smov 48   ;;  %s3931_s28 = smov 64   ;;  %vm767_vm2 = vcmask 130048  }
   0x8   :  { %3698 = vset.pattern.permute.xlu0 %v3923_v4  ;;  %3700 = vset.pattern.permute.xlu1 %v3924_v5  ;;  %v3569_v18 = vpack.c.bf16 %v782_v17, %v781_v16  ;;  %v3572_v21 = vpack.c.bf16 %v784_v20, %v783_v19  ;;  %s5229_s0 = sld [smem:[#allocation12_spill]]  ;;  %v621_v43 = vld [vmem:[%s5194_s4 + $0x8] sm:$0xff]  ;;  %v622_v44 = vld [vmem:[%s5194_s4 + $0x10] sm:$0xff]  ;;  %v620_v45 = vld [vmem:[%s5194_s4] sm:$0xff]  ;;  %vm769_vm3 = vcmask 261120   ;;  %vm771_vm4 = vcmask 392192  }
   0x9   :  { %736 = vperm.xlu0 %3698, %v677_v0   ;;  %744 = vperm.xlu1 %3700, %v677_v0   ;;  %v623_v46 = vld [vmem:[%s5194_s4 + $0x18] sm:$0xff]  ;;  %v640_v47 = vld [vmem:[%s5195_s5] sm:$0xff]  ;;  %v641_v48 = vld [vmem:[%s5195_s5 + $0x8] sm:$0xff]  ;;  %vm773_vm5 = vcmask 523264   ;;  %vm5220_vm6 = vcmask 654336   ;;  %v4159_v0 = vand.u32 127, %v618_v61 }
   0xa   :  { %3561 = vmatpush3.bf16.msra.mxu0 %v3560_v10  ;;  %v642_v49 = vld [vmem:[%s5195_s5 + $0x10] sm:$0xff]  ;;  %v643_v50 = vld [vmem:[%s5195_s5 + $0x18] sm:$0xff]  ;;  %vm859_vm9 = vcmask 64512   ;;  %v4177_v20 = vld [vmem:[%s5191_s1] ss:$0 sm:$0xff]  ;;  %s3939_s30 = smov 127  }
   0xb   :  { %3562 = vmatprep.subr.bf16.mxu0 %v5208_v9  ;;  %s3941_s19 = smov 31   ;;  %s3943_s20 = smov 63  }
   0xd   :  { %3702 = vset.pattern.permute.xlu1 %v5216_v1  ;;  %3701 = vset.pattern.permute.xlu0 %v5216_v1 }
   0xe   :  { %3564 = vmatpush3.bf16.msra.mxu0 %v3563_v12  ;;  %v4104_v31 = vld [vmem:[%s5229_s0 + $0x8] sm:$0xff]  ;;  %v4109_v32 = vld [vmem:[%s5229_s0] sm:$0xff]  ;;  %v4118_v35 = vld [vmem:[%s5229_s0 + $0x10] sm:$0xff] }
   0xf   :  { %3565 = vmatprep.subr.bf16.mxu0 %v5208_v9  ;;  %v59_v33 = vmul.f32 %v4104_v31, %v4104_v31  ;;  %v58_v34 = vmul.f32 %v4109_v32, %v4109_v32  ;;  %v4123_v36 = vld [vmem:[%s5229_s0 + $0x18] sm:$0xff]  ;;  %v60_v39 = vmul.f32 %v4118_v35, %v4118_v35  ;;  %s3940_s0 = smov 15  }
  0x10   :  { %v61_v40 = vmul.f32 %v4123_v36, %v4123_v36 }
  0x11   :  { %v66_v37 = vsel %vm62_vm1, %v59_v33, 0.0  ;;  %v63_v38 = vsel %vm62_vm1, %v58_v34, 0.0  ;;  %v69_v41 = vsel %vm62_vm1, %v60_v39, 0.0 }
  0x12   :  { %3567 = vmatpush3.bf16.msra.mxu0 %v3566_v15  ;;  %v72_v42 = vsel %vm62_vm1, %v61_v40, 0.0 }
  0x13   :  { %3568 = vmatprep.subr.bf16.mxu0 %v5208_v9 }
  0x16   :  { %3570 = vmatpush3.bf16.msra.mxu0 %v3569_v18 }
  0x17   :  { %3571 = vmatprep.subr.bf16.mxu0 %v5208_v9 }
  0x1a   :  { %3573 = vmatpush3.bf16.msra.mxu0 %v3572_v21 }
  0x83   :  { %v4082_v23 = vpop.permute.xlu0 %732  ;;  %v4084_v24 = vpop.permute.xlu1 %740 }
  0x84   :  { %v747_v25 = vmul.f32 %v4082_v23, %v4038_v3  ;;  %v749_v26 = vmul.f32 %v4084_v24, %v4038_v3 }
  0x86   :  { %752 = vrot.lane.b32.xlu1 %v747_v25, %s3928_s26 }
  0x88   :  { %v4091_v27 = vpop.permute.xlu0 %736  ;;  %v4093_v28 = vpop.permute.xlu1 %744 }
  0x89   :  { %v748_v29 = vmul.f32 %v4091_v27, %v4038_v3  ;;  %v750_v30 = vmul.f32 %v4093_v28, %v4038_v3 }
  0x8a   :  { %760 = vrot.lane.b32.xlu1 %v749_v26, %s3929_s6 }
  0x8b   :  { %756 = vrot.lane.b32.xlu0 %v748_v29, %s3930_s27 }
  0x8f   :  { %764 = vrot.lane.b32.xlu0 %v750_v30, %s3931_s28 }
  0xae   :  { %67 = vadd.xlane.f32.xlu0 %v66_v37  ;;  %64 = vadd.xlane.f32.xlu1 %v63_v38 }
  0xb2   :  { %70 = vadd.xlane.f32.xlu0 %v69_v41  ;;  %73 = vadd.xlane.f32.xlu1 %v72_v42 }
  0xc3   :  { %628 = vperm.xlu1 %3702, %v621_v43  }
  0xc7   :  { %631 = vperm.xlu1 %3702, %v622_v44  }
  0xc8   :  { %625 = vperm.xlu0 %3701, %v620_v45  }
  0xcb   :  { %634 = vperm.xlu1 %3702, %v623_v46  }
  0xcf   :  { %645 = vperm.xlu1 %3702, %v640_v47  }
  0xd3   :  { %648 = vperm.xlu1 %3702, %v641_v48  }
  0xd7   :  { %651 = vperm.xlu1 %3702, %v642_v49  }
  0xdb   :  { %654 = vperm.xlu1 %3702, %v643_v50  }
  0xf8   :  { %v753_v51 = vpop.permute.xlu1 %752 }
  0xf9   :  { %v768_v52 = vsel %vm767_vm2, %v4038_v3, %v753_v51 }
  0xfc   :  { %v761_v55 = vpop.permute.xlu1 %760 }
  0xfd   :  { %v757_v53 = vpop.permute.xlu0 %756 }
  0xfe   :  { %v770_v54 = vsel %vm769_vm3, %v768_v52, %v757_v53 }
  0xff   :  { %v772_v56 = vsel %vm771_vm4, %v770_v54, %v761_v55 }
 0x101   :  { %v765_v57 = vpop.permute.xlu0 %764 }
 0x102   :  { %v774_v58 = vsel %vm773_vm5, %v772_v56, %v765_v57 }
 0x103   :  { %3360 = vmatmul.mubr.msk.f32.vlgmr.msra.gmra.mrb[0].mxu0 %vm5220_vm6, %v774_v58 }
 0x13b   :  { %v68_v59 = vpop.xlane.xlu0 %67  ;;  %v65_v60 = vpop.xlane.xlu1 %64 }
 0x13c   :  { %3733 = vrsqrt.f32 %v68_v59  ;;  %vm84_vm7 = vcmp.eq.f32.partialorder %v68_v59, inf  ;;  %vm86_vm10 = vcmp.eq.f32.partialorder %v68_v59, 0.0  ;;  %v87_v6 = vand.u32 2147483648, %v68_v59 }
 0x13d   :  { %3735 = vrsqrt.f32 %v65_v60  ;;  %vm77_vm11 = vcmp.eq.f32.partialorder %v65_v60, inf  ;;  %vm79_vm12 = vcmp.eq.f32.partialorder %v65_v60, 0.0  ;;  %v80_v10 = vand.u32 2147483648, %v65_v60 }
 0x13f   :  { %v71_v62 = vpop.xlane.xlu0 %70  ;;  %v74_v63 = vpop.xlane.xlu1 %73 }
 0x140   :  { %3737 = vrsqrt.f32 %v71_v62  ;;  %vm91_vm13 = vcmp.eq.f32.partialorder %v71_v62, inf  ;;  %vm93_vm14 = vcmp.eq.f32.partialorder %v71_v62, 0.0  ;;  %v94_v16 = vand.u32 2147483648, %v71_v62 }
 0x141   :  { %3739 = vrsqrt.f32 %v74_v63  ;;  %v101_v26 = vand.u32 2147483648, %v74_v63 }
 0x143   :  { %v629_v3 = vpop.permute.xlu1 %628 }
 0x144   :  { %vm637_vm8 = vcmp.eq.s32.totalorder %v4159_v0, %v629_v3 }
 0x145   :  { %v4163_v14 = vsel %vm637_vm8, 1.0, %v5210_v22  ;;  %vm98_vm8 = vcmp.eq.f32.partialorder %v74_v63, inf }
 0x146   :  { %v3734_v5 = vpop.eup %3733 }
 0x147   :  { %v3736_v7 = vpop.eup %3735  ;;  %v83_v8 = vmul.f32 %v3734_v5, %v68_v59  ;;  %v626_v11 = vpop.permute.xlu0 %625 }
 0x148   :  { %v632_v12 = vpop.permute.xlu1 %631  ;;  %v76_v13 = vmul.f32 %v3736_v7, %v65_v60  ;;  %vm636_vm15 = vcmp.eq.s32.totalorder %v4159_v0, %v626_v11 }
 0x149   :  { %vm638_vm1 = vcmp.eq.s32.totalorder %v4159_v0, %v632_v12  ;;  %v85_v15 = vsel %vm84_vm7, %v68_v59, %v83_v8  ;;  %v4172_v18 = vsel %vm636_vm15, 1.0, %v5210_v22 }
 0x14a   :  { %v4169_v17 = vsel %vm638_vm1, 1.0, %v5210_v22  ;;  %v3738_v19 = vpop.eup %3737  ;;  %v88_v21 = vsel %vm86_vm10, %v87_v6, %v85_v15  ;;  %v78_v25 = vsel %vm77_vm11, %v65_v60, %v76_v13  ;;  %3364 = vmatprep.mubr.msk.f32.mxu1 %vm859_vm9, %v4172_v18  ;;  %vm100_vm10 = vcmp.eq.f32.partialorder %v74_v63, 0.0 }
 0x14b   :  { %v3740_v29 = vpop.eup %3739  ;;  %v104_v30 = vmax.f32 %v88_v21, 1e-12  ;;  %v4183_v33 = vmul.f32 0.25, %v88_v21  ;;  %v81_v34 = vsel %vm79_vm12, %v80_v10, %v78_v25  ;;  %v90_v37 = vmul.f32 %v3738_v19, %v71_v62  ;;  %3365 = vmatmul.mubr.msk.f32.vlgmr.msra.gmra.mrb[0].mxu1 %vm859_vm9, %v4163_v14 }
 0x14c   :  { %v635_v38 = vpop.permute.xlu1 %634  ;;  %v103_v39 = vmax.f32 %v81_v34, 1e-12  ;;  %v4188_v40 = vmul.f32 0.25, %v81_v34  ;;  %v97_v41 = vmul.f32 %v3740_v29, %v74_v63  ;;  %3367 = vmatprep.mubr.msk.f32.mxu1 %vm859_vm9, %v4169_v17  ;;  %v5214_v29 = vmov 1326507024  }
 0x14d   :  { %vm639_vm7 = vcmp.eq.s32.totalorder %v4159_v0, %v635_v38  ;;  %v4195_v42 = vmul.f32 %v4177_v20, %v4183_v33  ;;  %v92_v43 = vsel %vm91_vm13, %v71_v62, %v90_v37  ;;  %3741 = vrcp.f32 %v104_v30 }
 0x14e   :  { %v4199_v44 = vsel %vm639_vm7, 1.0, %v5210_v22  ;;  %v4202_v45 = vsel %vm93_vm14, %v94_v16, %v92_v43  ;;  %v99_v46 = vsel %vm98_vm8, %v74_v63, %v97_v41  ;;  %v4213_v50 = vmul.f32 %v4177_v20, %v4188_v40 }
 0x14f   :  { %5230 = vst [vmem:[#allocation5_spill] sm:$0xff] %v4199_v44  ;;  %v233_v47 = vand.u32 2139095040, %v4195_v42  ;;  %v105_v48 = vmax.f32 %v4202_v45, 1e-12  ;;  %3368 = vmatmul.mubr.msk.f32.gmra.mrb[2].mxu1 %vm859_vm9, %v4199_v44  ;;  %v4215_v51 = vsel %vm100_vm10, %v101_v26, %v99_v46  ;;  %3743 = vrcp.f32 %v103_v39 }
 0x150   :  { %v4209_v49 = vpop.permute.xlu1 %645  ;;  %v106_v53 = vmax.f32 %v4215_v51, 1e-12  ;;  %v5213_v55 = vand.u32 2147483647, %v4213_v50  ;;  %v129_v57 = vand.u32 2139095040, %v4213_v50 }
 0x151   :  { %vm5221_vm11 = vcmp.eq.s32.totalorder %v4159_v0, %v4209_v49  ;;  %v234_v52 = vshrl.u32 %v233_v47, 23  ;;  %3745 = vrcp.f32 %v105_v48  ;;  %v5212_v6 = vand.u32 2147483647, %v4195_v42 }
 0x152   :  { %v4224_v54 = vsel %vm5221_vm11, 1.0, %v5210_v22  ;;  %3747 = vrcp.f32 %v106_v53  ;;  %v130_v59 = vshrl.u32 %v129_v57, 23  ;;  %v133_v60 = vand.u32 8388607, %v5213_v55 }
 0x153   :  { %v3105_v56 = vadd.s32 4294967169, %v234_v52  ;;  %3372 = vmatprep.mubr.msk.f32.mxu1 %vm859_vm9, %v4224_v54  ;;  %v4253_v15 = vand.u32 8388607, %v5212_v6  ;;  %v3933_v34 = vmov 683565275  }
 0x154   :  { %v3101_v61 = vadd.s32 4294967169, %v130_v59  ;;  %v134_v8 = vor.u32 8388608, %v133_v60  ;;  %v3934_v41 = vmov 2475754826   ;;  %v3936_v48 = vmov 2102212464  }
 0x155   :  { %v240_v58 = vadd.s32 1, %v3105_v56  ;;  %v3937_v53 = vmov 920167782   ;;  %v238_v57 = vor.u32 8388608, %v4253_v15 }
 0x156   :  { %v136_v10 = vadd.s32 1, %v3101_v61  ;;  %v4259_v25 = vshll.u32 %v134_v8, 8 }
 0x157   :  { %vm241_vm12 = vcmp.gt.s32.totalorder %v240_v58, 0  ;;  %v4232_v62 = vpop.eup %3741 }
 0x158   :  { %v242_v63 = vsel %vm241_vm12, %v240_v58, 0  ;;  %v4238_v5 = vmul.f32 %v4232_v62, %v4104_v31  ;;  %vm137_vm13 = vcmp.gt.s32.totalorder %v136_v10, 0 }
 0x159   :  { %v4234_v3 = vand.u32 31, %v242_v63  ;;  %v4241_v7 = vpop.eup %3743  ;;  %v138_v31 = vsel %vm137_vm13, %v136_v10, 0  ;;  %v4257_v19 = vshrl.u32 %v242_v63, 5 }
 0x15a   :  { %685 = vperm.xlu0 %3701, %v4238_v5   ;;  %v614_v12 = vmul.f32 %v4241_v7, %v4109_v32  ;;  %v140_v21 = vand.u32 31, %v138_v31  ;;  %v139_v26 = vshrl.u32 %v138_v31, 5 }
 0x15b   :  { %v4244_v11 = vsub.s32 32, %v4234_v3  ;;  %v4249_v13 = vpop.eup %3745  ;;  %v247_v37 = vshll.u32 %v3933_v34, %v4234_v3  ;;  %vm262_vm7 = vcmp.lt.s32.totalorder %v4257_v19, 1  ;;  %vm263_vm10 = vcmp.lt.s32.totalorder %v4257_v19, 2 }
 0x15c   :  { %680 = vperm.xlu1 %3702, %v614_v12   ;;  %v4255_v16 = vpop.eup %3747  ;;  %v4264_v32 = vmul.f32 %v4249_v13, %v4118_v35  ;;  %v141_v38 = vsub.s32 32, %v140_v21  ;;  %v143_v39 = vshll.u32 %v3933_v34, %v140_v21  ;;  %v146_v43 = vshll.u32 %v3934_v41, %v140_v21 }
 0x15d   :  { %v4268_v30 = vshrl.u32 %v5214_v29, %v4244_v11  ;;  %v3935_v35 = vmov 2131351028   ;;  %v4279_v47 = vmul.f32 %v4255_v16, %v4123_v36  ;;  %v152_v52 = vshll.u32 %v3936_v48, %v140_v21 }
 0x15e   :  { %3704 = vset.pattern.permute.xlu0 %v3923_v4  ;;  %v149_v46 = vshll.u32 %v3935_v35, %v140_v21  ;;  %v155_v56 = vshll.u32 %v3937_v53, %v140_v21  ;;  %v142_v58 = vshrl.u32 %v3933_v34, %v141_v38  ;;  %v144_v59 = vshrl.u32 %v3934_v41, %v141_v38 }
 0x15f   :  { %703 = vperm.xlu0 %3704, %v4238_v5   ;;  %v147_v60 = vshrl.u32 %v3935_v35, %v141_v38  ;;  %v150_v61 = vshrl.u32 %v3936_v48, %v141_v38  ;;  %v153_v36 = vshrl.u32 %v3937_v53, %v141_v38  ;;  %v156_v63 = vshrl.u32 %v5214_v29, %v141_v38 }
 0x160   :  { %3703 = vset.pattern.permute.xlu1 %v3923_v4  ;;  %vm158_vm14 = vcmp.lt.s32.totalorder %v139_v26, 1  ;;  %v248_v8 = vshrl.u32 %v3934_v41, %v4244_v11  ;;  %v145_v10 = vor.u32 %v144_v59, %v143_v39  ;;  %vm161_vm15 = vcmp.lt.s32.totalorder %v139_v26, 4 }
 0x161   :  { %699 = vperm.xlu1 %3703, %v614_v12   ;;  %v148_v31 = vor.u32 %v147_v60, %v146_v43  ;;  %v151_v21 = vor.u32 %v150_v61, %v149_v46  ;;  %v154_v9 = vor.u32 %v153_v36, %v152_v52  ;;  %v157_v22 = vor.u32 %v156_v63, %v155_v56 }
 0x162   :  { %vm159_vm1 = vcmp.lt.s32.totalorder %v139_v26, 2  ;;  %vm160_vm8 = vcmp.lt.s32.totalorder %v139_v26, 3  ;;  %v162_v38 = vsel %vm158_vm14, %v142_v58, %v145_v10  ;;  %v250_v59 = vshll.u32 %v3934_v41, %v4234_v3 }
 0x163   :  { %3706 = vset.pattern.permute.xlu0 %v5216_v1  ;;  %v163_v6 = vsel %vm161_vm15, %v151_v21, 2102212464  ;;  %v166_v55 = vsel %vm158_vm14, %v145_v10, %v148_v31  ;;  %v170_v29 = vsel %vm158_vm14, %v148_v31, %v151_v21  ;;  %v167_v43 = vsel %vm161_vm15, %v154_v9, 920167782 }
 0x164   :  { %690 = vperm.xlu0 %3706, %v4264_v32   ;;  %v164_v39 = vsel %vm160_vm8, %v148_v31, %v163_v6  ;;  %v171_v46 = vsel %vm161_vm15, %v157_v22, 1326507024  ;;  %v168_v52 = vsel %vm160_vm8, %v151_v21, %v167_v43  ;;  %v246_v60 = vshrl.u32 %v3933_v34, %v4244_v11 }
 0x165   :  { %3705 = vset.pattern.permute.xlu1 %v3922_v2  ;;  %v172_v56 = vsel %vm160_vm8, %v154_v9, %v171_v46  ;;  %v251_v58 = vshrl.u32 %v3935_v35, %v4244_v11  ;;  %v165_v61 = vsel %vm159_vm1, %v162_v38, %v164_v39  ;;  %v249_v22 = vor.u32 %v248_v8, %v247_v37 }
 0x166   :  { %715 = vperm.xlu1 %3705, %v614_v12   ;;  %v169_v12 = vsel %vm159_vm1, %v166_v55, %v168_v52  ;;  %v173_v6 = vsel %vm159_vm1, %v170_v29, %v172_v56  ;;  %v253_v55 = vshll.u32 %v3935_v35, %v4234_v3  ;;  %v254_v26 = vshrl.u32 %v3936_v48, %v4244_v11 }
 0x167   :  { %v4310_v36 = vmul.u32.u64.low %v4259_v25, %v173_v6  ;;  %v4311_v9 = vmul.u32.u64.high %v4259_v25, %v173_v6, %v4310_v36  ;;  %v4314_v63 = vmul.u32.u64.low %v4259_v25, %v169_v12  ;;  %v4315_v10 = vmul.u32.u64.high %v4259_v25, %v169_v12, %v4314_v63 }
 0x168   :  { %3709 = vset.pattern.permute.xlu0 %v3923_v4  ;;  %v252_v31 = vor.u32 %v251_v58, %v250_v59  ;;  %v256_v29 = vshll.u32 %v3936_v48, %v4234_v3  ;;  %v181_v37 = vmul.u32 %v4259_v25, %v165_v61  ;;  %v257_v8 = vshrl.u32 %v3937_v53, %v4244_v11 }
 0x169   :  { %711 = vperm.xlu0 %3709, %v4279_v47   ;;  %v259_v21 = vshll.u32 %v3937_v53, %v4234_v3  ;;  %vm264_vm12 = vcmp.lt.s32.totalorder %v4257_v19, 3  ;;  %vm265_vm13 = vcmp.lt.s32.totalorder %v4257_v19, 4  ;;  %vm183_vm14 = vc.u32 %v4311_v9, %v4314_v63 }
 0x16a   :  { %719 = vperm.xlu1 %3705, %v4238_v5   ;;  %v255_v5 = vor.u32 %v254_v26, %v253_v55  ;;  %v184_v25 = vadd.s32 1, %v4315_v10  ;;  %v258_v38 = vor.u32 %v257_v8, %v256_v29  ;;  %v266_v39 = vsel %vm262_vm7, %v246_v60, %v249_v22 }
 0x16b   :  { %v261_v3 = vor.u32 %v4268_v30, %v259_v21  ;;  %v270_v43 = vsel %vm262_vm7, %v249_v22, %v252_v31  ;;  %v278_v60 = vshll.u32 %v238_v57, 8  ;;  %v4355_v12 = vmul.f32 0.25, %v4202_v45 }
 0x16c   :  { %v267_v11 = vsel %vm265_vm13, %v255_v5, 2102212464  ;;  %v274_v46 = vsel %vm262_vm7, %v252_v31, %v255_v5  ;;  %v185_v59 = vsel %vm183_vm14, %v184_v25, %v4315_v10  ;;  %v271_v56 = vsel %vm265_vm13, %v258_v38, 920167782 }
 0x16d   :  { %3721 = vset.pattern.permute.xlu0 %v5216_v1  ;;  %v268_v52 = vsel %vm264_vm12, %v252_v31, %v267_v11  ;;  %v186_v58 = vadd.s32 %v185_v59, %v181_v37  ;;  %v272_v30 = vsel %vm264_vm12, %v255_v5, %v271_v56  ;;  %v275_v61 = vsel %vm265_vm13, %v261_v3, 1326507024 }
 0x16e   :  { %3707 = vset.pattern.permute.xlu1 %v5216_v1  ;;  %v269_v6 = vsel %vm263_vm10, %v266_v39, %v268_v52  ;;  %v273_v22 = vsel %vm263_vm10, %v270_v43, %v272_v30  ;;  %v276_v15 = vsel %vm264_vm12, %v258_v38, %v275_v61  ;;  %v4378_v37 = vmul.f32 %v4177_v20, %v4355_v12 }
 0x16f   :  { %695 = vperm.xlu1 %3707, %v4279_v47   ;;  %v187_v57 = vadd.s32 536870912, %v186_v58  ;;  %v277_v36 = vsel %vm263_vm10, %v274_v46, %v276_v15  ;;  %v4365_v10 = vmul.u32.u64.low %v278_v60, %v273_v22  ;;  %v4366_v31 = vmul.u32.u64.high %v278_v60, %v273_v22, %v4365_v10 }
 0x170   :  { %v4370_v45 = vmul.u32.u64.low %v278_v60, %v277_v36  ;;  %v4371_v55 = vmul.u32.u64.high %v278_v60, %v277_v36, %v4370_v45  ;;  %v285_v29 = vmul.u32 %v278_v60, %v269_v6  ;;  %v337_v25 = vand.u32 2139095040, %v4378_v37 }
 0x171   :  { %v4374_v26 = vshrl.u32 %v187_v57, 30  ;;  %v288_v8 = vadd.s32 1, %v4366_v31  ;;  %v5218_v30 = vand.u32 2147483647, %v4378_v37 }
 0x172   :  { %vm287_vm15 = vc.u32 %v4371_v55, %v4365_v10  ;;  %v338_v3 = vshrl.u32 %v337_v25, 23  ;;  %v4410_v25 = vmul.f32 0.25, %v4215_v51  ;;  %v5231_v51 = vmov 1326507024  }
 0x173   :  { %3708 = vset.pattern.permute.xlu1 %v3923_v4  ;;  %v189_v19 = vshll.u32 %v4374_v26, 30  ;;  %v289_v21 = vsel %vm287_vm15, %v288_v8, %v4366_v31  ;;  %v341_v15 = vand.u32 8388607, %v5218_v30 }
 0x174   :  { %707 = vperm.xlu1 %3708, %v4264_v32   ;;  %v290_v5 = vadd.s32 %v289_v21, %v285_v29 }
 0x175   :  { %v4385_v4 = vsub.s32 %v186_v58, %v189_v19 }
 0x176   :  { %v291_v39 = vadd.s32 536870912, %v290_v5 }
 0x177   :  { %v192_v38 = vsub.s32 0, %v4385_v4 }
 0x178   :  { %3710 = vset.pattern.permute.xlu1 %v3922_v2  ;;  %v4393_v43 = vshrl.u32 %v291_v39, 30  ;;  %v3109_v2 = vadd.s32 4294967169, %v338_v3 }
 0x179   :  { %723 = vperm.xlu1 %3710, %v4264_v32   ;;  %v3102_v11 = vmin.u32 %v192_v38, %v4385_v4  ;;  %v342_v38 = vor.u32 8388608, %v341_v15 }
 0x17a   :  { %v293_v59 = vshll.u32 %v4393_v43, 30  ;;  %v344_v52 = vadd.s32 1, %v3109_v2 }
 0x17b   :  { %v194_v46 = vclz %v3102_v11  ;;  %v382_v1 = vshll.u32 %v342_v38, 8 }
 0x17c   :  { %v4396_v32 = vsub.s32 %v290_v5, %v293_v59  ;;  %vm345_vm1 = vcmp.gt.s32.totalorder %v344_v52, 0 }
 0x17d   :  { %727 = vperm.xlu1 %3710, %v4279_v47   ;;  %v3103_v56 = vadd.s32 4294967294, %v194_v46  ;;  %v346_v60 = vsel %vm345_vm1, %v344_v52, 0 }
 0x17e   :  { %v296_v58 = vsub.s32 0, %v4396_v32  ;;  %v348_v61 = vand.u32 31, %v346_v60  ;;  %v347_v45 = vshrl.u32 %v346_v60, 5 }
 0x17f   :  { %vm3104_vm8 = vcmp.lt.s32.totalorder %v3103_v56, 0 }
 0x180   :  { %v3106_v47 = vmin.u32 %v296_v58, %v4396_v32  ;;  %v349_v6 = vsub.s32 32, %v348_v61  ;;  %v197_v57 = vsel %vm3104_vm8, 0, %v3103_v56  ;;  %v351_v36 = vshll.u32 %v3933_v34, %v348_v61 }
 0x181   :  { %v354_v29 = vshll.u32 %v3934_v41, %v348_v61  ;;  %v357_v8 = vshll.u32 %v3935_v35, %v348_v61  ;;  %v360_v39 = vshll.u32 %v3936_v48, %v348_v61  ;;  %v202_v11 = vsub.s32 4294967266, %v197_v57 }
 0x182   :  { %v298_v22 = vclz %v3106_v47  ;;  %v352_v31 = vshrl.u32 %v3934_v41, %v349_v6  ;;  %v355_v19 = vshrl.u32 %v3935_v35, %v349_v6  ;;  %v358_v5 = vshrl.u32 %v3936_v48, %v349_v6 }
 0x183   :  { %v361_v3 = vshrl.u32 %v3937_v53, %v349_v6  ;;  %v363_v59 = vshll.u32 %v3937_v53, %v348_v61  ;;  %v350_v52 = vshrl.u32 %v3933_v34, %v349_v6  ;;  %vm366_vm7 = vcmp.lt.s32.totalorder %v347_v45, 1 }
 0x184   :  { %v3107_v21 = vadd.s32 4294967294, %v298_v22  ;;  %v353_v2 = vor.u32 %v352_v31, %v351_v36  ;;  %v356_v46 = vor.u32 %v355_v19, %v354_v29  ;;  %v359_v56 = vor.u32 %v358_v5, %v357_v8 }
 0x185   :  { %v362_v60 = vor.u32 %v361_v3, %v360_v39  ;;  %v182_v58 = vadd.s32 %v4314_v63, %v4311_v9  ;;  %v364_v47 = vshrl.u32 %v5231_v51, %v349_v6  ;;  %vm369_vm12 = vcmp.lt.s32.totalorder %v347_v45, 4 }
 0x186   :  { %vm3108_vm10 = vcmp.lt.s32.totalorder %v3107_v21, 0  ;;  %v198_v22 = vsub.s32 32, %v197_v57  ;;  %vm368_vm13 = vcmp.lt.s32.totalorder %v347_v45, 3  ;;  %v371_v15 = vsel %vm369_vm12, %v359_v56, 2102212464 }
 0x187   :  { %v203_v36 = vadd.s32 127, %v202_v11  ;;  %v365_v31 = vor.u32 %v364_v47, %v363_v59  ;;  %vm367_vm14 = vcmp.lt.s32.totalorder %v347_v45, 2  ;;  %v374_v61 = vsel %vm366_vm7, %v353_v2, %v356_v46 }
 0x188   :  { %v301_v29 = vsel %vm3108_vm10, 0, %v3107_v21  ;;  %v370_v19 = vsel %vm366_vm7, %v350_v52, %v353_v2  ;;  %v375_v8 = vsel %vm369_vm12, %v362_v60, 920167782  ;;  %v372_v5 = vsel %vm368_vm13, %v356_v46, %v371_v15 }
 0x189   :  { %v376_v9 = vsel %vm368_vm13, %v359_v56, %v375_v8  ;;  %v378_v63 = vsel %vm366_vm7, %v356_v46, %v359_v56  ;;  %v379_v6 = vsel %vm369_vm12, %v365_v31, 1326507024  ;;  %v199_v39 = vshll.u32 %v4385_v4, %v197_v57 }
 0x18a   :  { %v200_v3 = vshrl.u32 %v182_v58, %v198_v22  ;;  %v377_v38 = vsel %vm367_vm14, %v374_v61, %v376_v9  ;;  %v4428_v11 = vmul.f32 %v4177_v20, %v4410_v25  ;;  %v204_v21 = vshll.u32 %v203_v36, 23 }
 0x18b   :  { %v380_v2 = vsel %vm368_vm13, %v362_v60, %v379_v6  ;;  %v4431_v59 = vmul.u32.u64.low %v382_v1, %v377_v38  ;;  %v4432_v52 = vmul.u32.u64.high %v382_v1, %v377_v38, %v4431_v59  ;;  %v306_v47 = vsub.s32 4294967266, %v301_v29 }
 0x18c   :  { %v373_v46 = vsel %vm367_vm14, %v370_v19, %v372_v5  ;;  %v381_v56 = vsel %vm367_vm14, %v378_v63, %v380_v2  ;;  %v441_v58 = vand.u32 2139095040, %v4428_v11  ;;  %v201_v22 = vor.u32 %v200_v3, %v199_v39 }
 0x18d   :  { %v4437_v4 = vmul.u32.u64.low %v382_v1, %v381_v56  ;;  %v4438_v57 = vmul.u32.u64.high %v382_v1, %v381_v56, %v4437_v4  ;;  %v205_v20 = vor.u32 4788187, %v204_v21  ;;  %v389_v15 = vmul.u32 %v382_v1, %v373_v46 }
 0x18e   :  { %v392_v36 = vadd.s32 1, %v4432_v52  ;;  %v286_v60 = vadd.s32 %v4365_v10, %v4371_v55  ;;  %v302_v31 = vsub.s32 32, %v301_v29  ;;  %v307_v61 = vadd.s32 127, %v306_v47 }
 0x18f   :  { %v442_v8 = vshrl.u32 %v441_v58, 23  ;;  %vm391_vm15 = vc.u32 %v4438_v57, %v4431_v59  ;;  %v206_v5 = vand.u32 2147483647, %v205_v20  ;;  %v208_v9 = vcvt.s32.f32 %v201_v22 }
 0x190   :  { %v393_v45 = vsel %vm391_vm15, %v392_v36, %v4432_v52  ;;  %v303_v6 = vshll.u32 %v4396_v32, %v301_v29  ;;  %v304_v1 = vshrl.u32 %v286_v60, %v302_v31  ;;  %v308_v39 = vshll.u32 %v307_v61, 23 }
 0x191   :  { %v3113_v19 = vadd.s32 4294967169, %v442_v8  ;;  %v394_v63 = vadd.s32 %v393_v45, %v389_v15  ;;  %v209_v21 = vmul.f32 %v208_v9, %v206_v5  ;;  %v5217_v56 = vand.u32 2147483647, %v4428_v11 }
 0x192   :  { %v305_v2 = vor.u32 %v304_v1, %v303_v6  ;;  %v309_v47 = vor.u32 4788187, %v308_v39  ;;  %v4454_v32 = vmul.f32 %v4188_v40, %v4188_v40  ;;  %vm128_vm8 = vcmp.lt.s32.totalorder %v4213_v50, 0 }
 0x193   :  { %v448_v3 = vadd.s32 1, %v3113_v19  ;;  %v395_v38 = vadd.s32 536870912, %v394_v63  ;;  %v210_v22 = vxor.u32 2147483648, %v209_v21  ;;  %v445_v36 = vand.u32 8388607, %v5217_v56 }
 0x194   :  { %v310_v29 = vand.u32 2147483647, %v309_v47  ;;  %v312_v20 = vcvt.s32.f32 %v305_v2  ;;  %v554_v1 = vmul.f32 %v4454_v32, %v4454_v32  ;;  %v390_v30 = vadd.s32 %v4431_v59, %v4438_v57 }
 0x195   :  { %vm449_vm1 = vcmp.gt.s32.totalorder %v448_v3, 0  ;;  %v4448_v10 = vshrl.u32 %v395_v38, 30  ;;  %v211_v38 = vsel %vm128_vm8, %v210_v22, %v209_v21  ;;  %v446_v2 = vor.u32 8388608, %v445_v36 }
 0x196   :  { %v450_v55 = vsel %vm449_vm1, %v448_v3, 0  ;;  %v313_v39 = vmul.f32 %v312_v20, %v310_v29  ;;  %vm232_vm1 = vcmp.lt.s32.totalorder %v4195_v42, 0 }
 0x197   :  { %v452_v46 = vand.u32 31, %v450_v55  ;;  %v397_v52 = vshll.u32 %v4448_v10, 30  ;;  %v451_v9 = vshrl.u32 %v450_v55, 5  ;;  %v486_v22 = vshll.u32 %v446_v2, 8 }
 0x199   :  { %v453_v4 = vsub.s32 32, %v452_v46  ;;  %v398_v58 = vsub.s32 %v394_v63, %v397_v52  ;;  %v455_v60 = vshll.u32 %v3933_v34, %v452_v46  ;;  %v458_v61 = vshll.u32 %v3934_v41, %v452_v46 }
 0x19a   :  { %v464_v45 = vshll.u32 %v3936_v48, %v452_v46  ;;  %v461_v63 = vshll.u32 %v3935_v35, %v452_v46  ;;  %v467_v52 = vshll.u32 %v3937_v53, %v452_v46  ;;  %vm470_vm10 = vcmp.lt.s32.totalorder %v451_v9, 1 }
 0x19b   :  { %v400_v15 = vsub.s32 0, %v398_v58  ;;  %v456_v31 = vshrl.u32 %v3934_v41, %v453_v4  ;;  %v459_v8 = vshrl.u32 %v3935_v35, %v453_v4  ;;  %v465_v19 = vshrl.u32 %v3937_v53, %v453_v4 }
 0x19c   :  { %v462_v6 = vshrl.u32 %v3936_v48, %v453_v4  ;;  %v5232_v41 = vand.u32 2147483647, %v4213_v50  ;;  %v454_v29 = vshrl.u32 %v3933_v34, %v453_v4  ;;  %vm473_vm12 = vcmp.lt.s32.totalorder %v451_v9, 4 }
 0x19d   :  { %v3110_v5 = vmin.u32 %v400_v15, %v398_v58  ;;  %v457_v35 = vor.u32 %v456_v31, %v455_v60  ;;  %v460_v47 = vor.u32 %v459_v8, %v458_v61  ;;  %v466_v48 = vor.u32 %v465_v19, %v464_v45 }
 0x19e   :  { %vm4471_vm7 = vcmp.le.f32.partialorder %v5232_v41, 0.7853982  ;;  %v468_v15 = vshrl.u32 %v5231_v51, %v453_v4  ;;  %v463_v20 = vor.u32 %v462_v6, %v461_v63  ;;  %v314_v41 = vxor.u32 2147483648, %v313_v39 }
 0x19f   :  { %v402_v55 = vclz %v3110_v5  ;;  %vm472_vm14 = vcmp.lt.s32.totalorder %v451_v9, 3  ;;  %vm471_vm15 = vcmp.lt.s32.totalorder %v451_v9, 2  ;;  %v478_v53 = vsel %vm470_vm10, %v457_v35, %v460_v47 }
 0x1a0   :  { %v469_v44 = vor.u32 %v468_v15, %v467_v52  ;;  %v475_v21 = vsel %vm473_vm12, %v463_v20, 2102212464  ;;  %v479_v51 = vsel %vm473_vm12, %v466_v48, 920167782  ;;  %v474_v60 = vsel %vm470_vm10, %v454_v29, %v457_v35 }
 0x1a1   :  { %v3111_v56 = vadd.s32 4294967294, %v402_v55  ;;  %v476_v59 = vsel %vm472_vm14, %v460_v47, %v475_v21  ;;  %v480_v57 = vsel %vm472_vm14, %v463_v20, %v479_v51  ;;  %v482_v31 = vsel %vm470_vm10, %v460_v47, %v463_v20 }
 0x1a2   :  { %v483_v61 = vsel %vm473_vm12, %v469_v44, 1326507024  ;;  %v481_v45 = vsel %vm471_vm15, %v478_v53, %v480_v57  ;;  %v477_v44 = vsel %vm471_vm15, %v474_v60, %v476_v59  ;;  %v5235_v29 = vand.u32 2147483647, %v4195_v42 }
 0x1a3   :  { %vm3112_vm13 = vcmp.lt.s32.totalorder %v3111_v56, 0  ;;  %v484_v19 = vsel %vm472_vm14, %v466_v48, %v483_v61  ;;  %v4496_v5 = vmul.u32.u64.low %v486_v22, %v481_v45  ;;  %v4497_v63 = vmul.u32.u64.high %v486_v22, %v481_v45, %v4496_v5 }
 0x1a4   :  { %v405_v36 = vsel %vm3112_vm13, 0, %v3111_v56  ;;  %v485_v2 = vsel %vm471_vm15, %v482_v31, %v484_v19  ;;  %v212_v48 = vsub.s32 4, %v4374_v26  ;;  %vm4512_vm10 = vcmp.le.f32.partialorder %v5235_v29, 0.7853982 }
 0x1a5   :  { %v406_v34 = vsub.s32 32, %v405_v36  ;;  %v407_v46 = vshll.u32 %v398_v58, %v405_v36  ;;  %v410_v4 = vsub.s32 4294967266, %v405_v36  ;;  %v214_v58 = vsel %vm4471_vm7, %v4213_v50, %v211_v38 }
 0x1a6   :  { %v4504_v35 = vmul.u32.u64.low %v486_v22, %v485_v2  ;;  %v4505_v47 = vmul.u32.u64.high %v486_v22, %v485_v2, %v4504_v35  ;;  %v551_v38 = vmul.f32 %v4183_v33, %v4183_v33  ;;  %3749 = vcosq.f32 %v214_v58 }
 0x1a7   :  { %v408_v56 = vshrl.u32 %v390_v30, %v406_v34  ;;  %v411_v8 = vadd.s32 127, %v410_v4  ;;  %v315_v30 = vsel %vm232_vm1, %v314_v41, %v313_v39  ;;  %v493_v9 = vmul.u32 %v486_v22, %v477_v44 }
 0x1a8   :  { %v496_v39 = vadd.s32 1, %v4497_v63  ;;  %3751 = vsinq.f32 %v214_v58  ;;  %v558_v41 = vmul.f32 %v554_v1, %v4454_v32  ;;  %v318_v21 = vsel %vm4512_vm10, %v4195_v42, %v315_v30 }
 0x1a9   :  { %v409_v6 = vor.u32 %v408_v56, %v407_v46  ;;  %v412_v55 = vshll.u32 %v411_v8, 23  ;;  %v316_v53 = vsub.s32 4, %v4393_v43  ;;  %vm495_vm12 = vc.u32 %v4505_v47, %v4496_v5 }
 0x1aa   :  { %v213_v51 = vsel %vm128_vm8, %v212_v48, %v4374_v26  ;;  %v420_v34 = vsub.s32 4, %v4448_v10  ;;  %v497_v46 = vsel %vm495_vm12, %v496_v39, %v4497_v63  ;;  %v555_v32 = vmul.f32 %v551_v38, %v551_v38 }
 0x1ab   :  { %v413_v52 = vor.u32 4788187, %v412_v55  ;;  %v416_v15 = vcvt.s32.f32 %v409_v6  ;;  %3753 = vcosq.f32 %v318_v21  ;;  %vm336_vm13 = vcmp.lt.s32.totalorder %v4378_v37, 0 }
 0x1ac   :  { %v498_v1 = vadd.s32 %v497_v46, %v493_v9  ;;  %v562_v4 = vmul.f32 %v558_v41, %v4188_v40  ;;  %3755 = vsinq.f32 %v318_v21  ;;  %v215_v59 = vsel %vm4471_vm7, 0, %v213_v51 }
 0x1ad   :  { %v414_v36 = vand.u32 2147483647, %v413_v52  ;;  %v570_v57 = vmul.f32 28.0, %v558_v41  ;;  %v317_v26 = vsel %vm232_vm1, %v316_v53, %v4393_v43  ;;  %v5238_v61 = vand.u32 2147483647, %v4378_v37 }
 0x1ae   :  { %v499_v31 = vadd.s32 536870912, %v498_v1  ;;  %v421_v45 = vsel %vm336_vm13, %v420_v34, %v4448_v10  ;;  %v552_v58 = vmul.f32 %v4355_v12, %v4355_v12  ;;  %v559_v3 = vmul.f32 %v555_v32, %v551_v38 }
 0x1af   :  { %v417_v22 = vmul.f32 %v416_v15, %v414_v36  ;;  %vm4538_vm8 = vcmp.le.f32.partialorder %v5238_v61, 0.7853982  ;;  %v219_v43 = vadd.s32 3, %v215_v59  ;;  %v319_v6 = vsel %vm4512_vm10, 0, %v317_v26  ;;  %v4570_v26 = vpop.permute.xlu1 %648 }
 0x1b0   :  { %v4548_v63 = vshrl.u32 %v499_v31, 30  ;;  %v3750_v55 = vpop.eup %3749  ;;  %v423_v44 = vsel %vm4538_vm8, 0, %v421_v45  ;;  %v566_v30 = vmul.f32 %v562_v4, %v4188_v40  ;;  %v574_v35 = vsub.f32 1.0, %v570_v57 }
 0x1b1   :  { %v418_v60 = vxor.u32 2147483648, %v417_v22  ;;  %v578_v38 = vmul.f32 48.0, %v562_v4  ;;  %v556_v48 = vmul.f32 %v552_v58, %v552_v58  ;;  %v563_v52 = vmul.f32 %v559_v3, %v4183_v33 }
 0x1b2   :  { %v501_v10 = vshll.u32 %v4548_v63, 30  ;;  %v3752_v2 = vpop.eup %3751  ;;  %v323_v15 = vadd.s32 3, %v319_v6  ;;  %v220_v20 = vand.u32 3, %v219_v43  ;;  %v427_v9 = vadd.s32 3, %v423_v44 }
 0x1b3   :  { %v419_v8 = vsel %vm336_vm13, %v418_v60, %v417_v22  ;;  %v223_v41 = vxor.u32 2147483648, %v3752_v2  ;;  %v226_v21 = vxor.u32 2147483648, %v3750_v55  ;;  %v4560_v51 = vadd.f32 %v578_v38, %v574_v35 }
 0x1b4   :  { %v422_v19 = vsel %vm4538_vm8, %v4378_v37, %v419_v8  ;;  %v4557_v29 = vsub.s32 %v498_v1, %v501_v10  ;;  %v4562_v22 = vmul.f32 21.0, %v566_v30  ;;  %v4564_v34 = vmul.f32 28.0, %v559_v3 }
 0x1b5   :  { %3757 = vcosq.f32 %v422_v19  ;;  %v3754_v39 = vpop.eup %3753  ;;  %v560_v46 = vmul.f32 %v556_v48, %v552_v58  ;;  %vm218_vm7 = vweird.f32 %v4213_v50  ;;  %vm594_vm14 = vcmp.lt.f32.partialorder %v4188_v40, 1.0  ;;  %v1054_v40 = vld [vmem:[%s5198_s8] sm:$0xff] }
 0x1b6   :  { %3759 = vsinq.f32 %v422_v19  ;;  %v504_v36 = vsub.s32 0, %v4557_v29  ;;  %v3756_v53 = vpop.eup %3755  ;;  %v324_v32 = vand.u32 3, %v323_v15  ;;  %v567_v1 = vmul.f32 %v563_v52, %v4183_v33 }
 0x1b7   :  { %v579_v4 = vmul.f32 48.0, %v563_v52  ;;  %vm222_vm15 = vcmp.eq.s32.totalorder %v220_v20, 0  ;;  %vm225_vm1 = vcmp.eq.s32.totalorder %v220_v20, 2  ;;  %v330_v59 = vxor.u32 2147483648, %v3754_v39 }
 0x1b8   :  { %v3114_v60 = vmin.u32 %v504_v36, %v4557_v29  ;;  %v428_v57 = vand.u32 3, %v427_v9  ;;  %v224_v31 = vsel %vm222_vm15, %v3750_v55, %v223_v41  ;;  %v227_v61 = vsel %vm225_vm1, %v226_v21, %v3752_v2 }
 0x1b9   :  { %v327_v56 = vxor.u32 2147483648, %v3756_v53  ;;  %vm221_vm10 = vcmp.lt.s32.totalorder %v220_v20, 2  ;;  %v575_v58 = vsub.f32 1.0, %v4564_v34  ;;  %v564_v3 = vmul.f32 %v560_v46, %v4355_v12  ;;  %v4579_v20 = vpop.permute.xlu1 %651 }
 0x1ba   :  { %v506_v8 = vclz %v3114_v60  ;;  %v572_v19 = vmul.f32 28.0, %v560_v46  ;;  %vm657_vm12 = vcmp.eq.s32.totalorder %v4159_v0, %v4570_v26  ;;  %vm326_vm13 = vcmp.eq.s32.totalorder %v324_v32, 0 }
 0x1bb   :  { %vm329_vm8 = vcmp.eq.s32.totalorder %v324_v32, 2  ;;  %v228_v10 = vsel %vm221_vm10, %v224_v31, %v227_v61  ;;  %vm430_vm15 = vcmp.eq.s32.totalorder %v428_v57, 0  ;;  %v328_v30 = vsel %vm326_vm13, %v3754_v39, %v327_v56 }
 0x1bc   :  { %v3115_v44 = vadd.s32 4294967294, %v506_v8  ;;  %v331_v55 = vsel %vm329_vm8, %v330_v59, %v3756_v53  ;;  %vm433_vm1 = vcmp.eq.s32.totalorder %v428_v57, 2  ;;  %v494_v35 = vadd.s32 %v4496_v5, %v4505_v47 }
 0x1bd   :  { %v568_v52 = vmul.f32 %v564_v3, %v4355_v12  ;;  %vm325_vm11 = vcmp.lt.s32.totalorder %v324_v32, 2  ;;  %v229_v39 = vsel %vm218_vm7, nan, %v228_v10  ;;  %vm429_vm10 = vcmp.lt.s32.totalorder %v428_v57, 2 }
 0x1be   :  { %vm3116_vm6 = vcmp.lt.s32.totalorder %v3115_v44, 0  ;;  %v332_v36 = vsel %vm325_vm11, %v328_v30, %v331_v55  ;;  %v576_v53 = vsub.f32 1.0, %v572_v19  ;;  %v580_v47 = vmul.f32 48.0, %v564_v3 }
 0x1bf   :  { %v3758_v45 = vpop.eup %3757  ;;  %v509_v15 = vsel %vm3116_vm6, 0, %v3115_v44  ;;  %vm658_vm6 = vcmp.eq.s32.totalorder %v4159_v0, %v4579_v20  ;;  %v5241_v60 = vmov 0.0   ;;  %vm322_vm13 = vweird.f32 %v4195_v42 }
 0x1c0   :  { %v3760_v43 = vpop.eup %3759  ;;  %v434_v6 = vxor.u32 2147483648, %v3758_v45  ;;  %v510_v9 = vsub.s32 32, %v509_v15  ;;  %v511_v41 = vshll.u32 %v4557_v29, %v509_v15  ;;  %v514_v21 = vsub.s32 4294967266, %v509_v15 }
 0x1c1   :  { %v431_v2 = vxor.u32 2147483648, %v3760_v43  ;;  %v3117_v32 = vsel %vm594_vm14, 1.0, %v5241_v60  ;;  %vm426_vm8 = vweird.f32 %v4378_v37  ;;  %v542_v50 = vmul.f32 0.5, %v229_v39 }
 0x1c2   :  { %v435_v48 = vsel %vm433_vm1, %v434_v6, %v3760_v43  ;;  %v512_v34 = vshrl.u32 %v494_v35, %v510_v9  ;;  %v515_v46 = vadd.s32 127, %v514_v21  ;;  %v333_v29 = vsel %vm322_vm13, nan, %v332_v36 }
 0x1c3   :  { %v432_v38 = vsel %vm430_vm15, %v3758_v45, %v431_v2  ;;  %v590_v31 = vsub.f32 %v4560_v51, %v4562_v22  ;;  %v583_v61 = vadd.f32 %v579_v4, %v575_v58  ;;  %v587_v56 = vmul.f32 21.0, %v567_v1  ;;  %v4593_v45 = vpop.permute.xlu1 %654 }
 0x1c4   :  { %v436_v5 = vsel %vm429_vm10, %v432_v38, %v435_v48  ;;  %v513_v59 = vor.u32 %v512_v34, %v511_v41  ;;  %v516_v57 = vshll.u32 %v515_v46, 23  ;;  %v584_v42 = vadd.f32 %v580_v47, %v576_v53 }
 0x1c5   :  { %v437_v8 = vsel %vm426_vm8, nan, %v436_v5  ;;  %v588_v37 = vmul.f32 21.0, %v568_v52  ;;  %v4604_v51 = vsel %vm657_vm12, 1.0, %v5241_v60  ;;  %v543_v1 = vmul.f32 0.5, %v333_v29 }
 0x1c6   :  { %v517_v19 = vor.u32 4788187, %v516_v57  ;;  %v520_v43 = vcvt.s32.f32 %v513_v59  ;;  %vm595_vm11 = vcmp.lt.f32.partialorder %v4183_v33, 1.0  ;;  %v553_v4 = vmul.f32 %v4410_v25, %v4410_v25 }
 0x1c7   :  { %v546_v58 = vmul.f32 %v4241_v7, %v542_v50  ;;  %v544_v6 = vmul.f32 0.5, %v437_v8  ;;  %vm596_vm7 = vcmp.lt.f32.partialorder %v4355_v12, 1.0  ;;  %v4617_v10 = vsel %vm658_vm6, 1.0, %v5241_v60 }
 0x1c8   :  { %v518_v44 = vand.u32 2147483647, %v517_v19  ;;  %vm659_vm14 = vcmp.eq.s32.totalorder %v4159_v0, %v4593_v45  ;;  %v4623_v33 = vmul.f32 %v3117_v32, %v590_v31  ;;  %v591_v7 = vsub.f32 %v583_v61, %v587_v56 }
 0x1c9   :  { %v3118_v12 = vsel %vm595_vm11, 1.0, %v5241_v60  ;;  %v592_v55 = vsub.f32 %v584_v42, %v588_v37  ;;  %v524_v30 = vsub.s32 4, %v4548_v63  ;;  %v547_v35 = vmul.f32 %v4232_v62, %v543_v1 }
 0x1ca   :  { %v521_v2 = vmul.f32 %v520_v43, %v518_v44  ;;  %v3119_v38 = vsel %vm596_vm7, 1.0, %v5241_v60  ;;  %vm440_vm15 = vcmp.lt.s32.totalorder %v4428_v11, 0  ;;  %v557_v48 = vmul.f32 %v553_v4, %v553_v4 }
 0x1cb   :  { %v4636_v52 = vsel %vm659_vm14, 1.0, %v5241_v60  ;;  %v4639_v15 = vmul.f32 %v4623_v33, %v546_v58  ;;  %v548_v9 = vmul.f32 %v4249_v13, %v544_v6  ;;  %v4644_v62 = vmul.f32 %v3118_v12, %v591_v7 }
 0x1cc   :  { %v522_v41 = vxor.u32 2147483648, %v521_v2  ;;  %v4648_v21 = vmul.f32 %v3119_v38, %v592_v55  ;;  %v5242_v39 = vand.u32 2147483647, %v4428_v11  ;;  %v525_v53 = vsel %vm440_vm15, %v524_v30, %v4548_v63 }
 0x1cd   :  { %v4654_v5 = vmul.f32 %v4644_v62, %v547_v35  ;;  %v561_v47 = vmul.f32 %v557_v48, %v553_v4  ;;  %vm597_vm8 = vcmp.lt.f32.partialorder %v4410_v25, 1.0  ;;  %vm530_vm7 = vweird.f32 %v4428_v11 }
 0x1ce   :  { %vm439_vm1 = vcmp.le.f32.partialorder %v5242_v39, 0.7853982  ;;  %v523_v36 = vsel %vm440_vm15, %v522_v41, %v521_v2  ;;  %v4658_v34 = vmul.f32 %v4648_v21, %v548_v9  ;;  %v3120_v58 = vsel %vm597_vm8, 1.0, %v5241_v60 }
 0x1cf   :  { %v526_v13 = vsel %vm439_vm1, %v4428_v11, %v523_v36  ;;  %v527_v46 = vsel %vm439_vm1, 0, %v525_v53  ;;  %v565_v63 = vmul.f32 %v561_v47, %v4410_v25  ;;  %v573_v32 = vmul.f32 28.0, %v561_v47 }
 0x1d0   :  { %3761 = vcosq.f32 %v526_v13  ;;  %v531_v50 = vadd.s32 3, %v527_v46  ;;  %vm5250_vm15 = vcmp.eq.s32.totalorder %v4159_v0, %v4209_v49 }
 0x1d1   :  { %3763 = vsinq.f32 %v526_v13  ;;  %v569_v29 = vmul.f32 %v565_v63, %v4410_v25  ;;  %v577_v59 = vsub.f32 1.0, %v573_v32  ;;  %v581_v57 = vmul.f32 48.0, %v565_v63 }
 0x1d2   :  { %v532_v31 = vand.u32 3, %v531_v50 }
 0x1d3   :  { %v589_v42 = vmul.f32 21.0, %v569_v29 }
 0x1d4   :  { %vm537_vm10 = vcmp.eq.s32.totalorder %v532_v31, 2  ;;  %vm534_vm13 = vcmp.eq.s32.totalorder %v532_v31, 0  ;;  %vm533_vm11 = vcmp.lt.s32.totalorder %v532_v31, 2 }
 0x1d6   :  { %v4595_v3 = vpop.f32.mrb[0].mxu0 }
 0x1d7   :  { %v3361_v22 = vpop.f32.mrb[1].mxu0  ;;  %3370 = vmatprep.subr.mxu1 %v4595_v3 }
 0x1d8   :  { %3371 = vmatpush3.msra.mxu1 %v4595_v3 }
 0x1d9   :  { %3373 = vmatmul.mubr.msk.f32.vlgmr.msra.gmra.mrb[4].mxu1 %vm859_vm9, %v4604_v51  ;;  %3378 = vmatprep.subr.mxu1 %v1054_v40  ;;  %v4685_v30 = vpop.permute.xlu0 %685 }
 0x1da   :  { %3375 = vmatprep.mubr.msk.f32.mxu1 %vm859_vm9, %v4617_v10  ;;  %3379 = vmatpush3.msra.mxu1 %v1054_v40  ;;  %v3762_v61 = vpop.eup %3761  ;;  %v585_v40 = vadd.f32 %v581_v57, %v577_v59 }
 0x1db   :  { %v3764_v56 = vpop.eup %3763  ;;  %v538_v8 = vxor.u32 2147483648, %v3762_v61  ;;  %v4677_v25 = vpop.permute.xlu1 %680 }
 0x1dc   :  { %v535_v37 = vxor.u32 2147483648, %v3764_v56  ;;  %v593_v1 = vsub.f32 %v585_v40, %v589_v42  ;;  %v1180_v42 = vld [vmem:[%s5199_s9] sm:$0xff] }
 0x1dd   :  { %3376 = vmatmul.mubr.msk.f32.gmra.mrb[6].mxu1 %vm859_vm9, %v4636_v52  ;;  %v539_v19 = vsel %vm537_vm10, %v538_v8, %v3764_v56 }
 0x1de   :  { %3380 = vmatprep.mubr.msk.f32.mxu1 %vm859_vm9, %v4639_v15  ;;  %v536_v43 = vsel %vm534_vm13, %v3762_v61, %v535_v37  ;;  %v4670_v7 = vmul.f32 %v3120_v58, %v593_v1  ;;  %v4698_v41 = vpop.permute.xlu0 %703  ;;  %v1181_v37 = vld [vmem:[%s5199_s9 + $0x8] sm:$0xff] }
 0x1df   :  { %v540_v22 = vsel %vm533_vm11, %v536_v43, %v539_v19  ;;  %v3574_v19 = vpack.c.bf16 %v1181_v37, %v1180_v42 }
 0x1e0   :  { %v541_v4 = vsel %vm530_vm7, nan, %v540_v22  ;;  %v4679_v55 = vpop.permute.xlu1 %699 }
 0x1e1   :  { %3381 = vmatmul.mubr.msk.f32.vlgmr.msra.gmra.mrb[8].mxu1 %vm859_vm9, %v4654_v5  ;;  %v545_v6 = vmul.f32 0.5, %v541_v4  ;;  %3575 = vmatprep.subr.bf16.mxu0 %v3574_v19 }
 0x1e2   :  { %3383 = vmatprep.mubr.msk.f32.mxu1 %vm859_vm9, %v4658_v34  ;;  %3577 = vmatpush3.bf16.msra.mxu0 %v3574_v19 }
 0x1e3   :  { %v549_v44 = vmul.f32 %v4255_v16, %v545_v6  ;;  %v4715_v63 = vpop.permute.xlu0 %690 }
 0x1e4   :  { %5245 = vst [vmem:[#allocation8_spill] sm:$0xff] %v4715_v63 }
 0x1e5   :  { %v4673_v12 = vmul.f32 %v4670_v7, %v549_v44  ;;  %v4681_v11 = vpop.permute.xlu1 %715 }
 0x1e7   :  { %3384 = vmatmul.mubr.msk.f32.gmra.mrb[10].mxu1 %vm859_vm9, %v4673_v12 }
 0x1e8   :  { %v4728_v57 = vpop.permute.xlu0 %711 }
 0x1e9   :  { %v4683_v2 = vpop.permute.xlu1 %719  ;;  %5247 = vst [vmem:[#allocation10_spill] sm:$0xff] %v4728_v57 }
 0x1ee   :  { %v4693_v48 = vpop.permute.xlu1 %695 }
 0x1ef   :  { %5243 = vst [vmem:[#allocation6_spill] sm:$0xff] %v4693_v48 }
 0x1f3   :  { %v4710_v47 = vpop.permute.xlu1 %707 }
 0x1f4   :  { %5244 = vst [vmem:[#allocation7_spill] sm:$0xff] %v4710_v47 }
 0x1f8   :  { %v4723_v29 = vpop.permute.xlu1 %723 }
 0x1f9   :  { %5246 = vst [vmem:[#allocation9_spill] sm:$0xff] %v4723_v29 }
 0x1fc   :  { %v4736_v56 = vpop.permute.xlu1 %727 }
 0x1fd   :  { %5248 = vst [vmem:[#allocation11_spill] sm:$0xff] %v4736_v56 }
 0x21e   :  { %v4687_v35 = vpop.f32.mrb[0].mxu1 }
 0x21f   :  { %v4689_v16 = vpop.f32.mrb[1].mxu1  ;;  %v1535_v38 = vmul.f32 %v4687_v35, %v4685_v30  ;;  %v1539_v53 = vmul.f32 %v4687_v35, %v4698_v41  ;;  %v1543_v46 = vmul.f32 %v4687_v35, %v4683_v2 }
 0x220   :  { %v1534_v9 = vmul.f32 %v4689_v16, %v4677_v25  ;;  %v1538_v13 = vmul.f32 %v4689_v16, %v4679_v55  ;;  %v1542_v32 = vmul.f32 %v4689_v16, %v4681_v11 }
 0x221   :  { %1552 = vrot.lane.b32.xlu1 %v1535_v38, %s3928_s26 }
 0x222   :  { %v4700_v39 = vpop.f32.mrb[2].mxu1  ;;  %1550 = vrot.lane.b32.xlu0 %v1534_v9, %s3928_s26 }
 0x223   :  { %v4703_v36 = vpop.f32.mrb[3].mxu1  ;;  %v1537_v50 = vmul.f32 %v4700_v39, %v4693_v48  ;;  %v1541_v31 = vmul.f32 %v4700_v39, %v4728_v57  ;;  %v1545_v8 = vmul.f32 %v4700_v39, %v4736_v56 }
 0x224   :  { %v1536_v59 = vmul.f32 %v4703_v36, %v4715_v63  ;;  %v1540_v61 = vmul.f32 %v4703_v36, %v4710_v47  ;;  %v1544_v40 = vmul.f32 %v4703_v36, %v4723_v29  ;;  %v5249_v29 = vmov 0.0|0.0  }
 0x225   :  { %1568 = vrot.lane.b32.xlu1 %v1539_v53, %s3930_s27 }
 0x226   :  { %1566 = vrot.lane.b32.xlu0 %v1538_v13, %s3930_s27 }
 0x229   :  { %1584 = vrot.lane.b32.xlu1 %v1543_v46, %s3929_s6 }
 0x22a   :  { %1582 = vrot.lane.b32.xlu0 %v1542_v32, %s3929_s6 }
 0x22d   :  { %1556 = vrot.lane.b32.xlu1 %v1537_v50, %s3928_s26 }
 0x22e   :  { %1554 = vrot.lane.b32.xlu0 %v1536_v59, %s3928_s26 }
 0x231   :  { %1572 = vrot.lane.b32.xlu1 %v1541_v31, %s3930_s27 }
 0x232   :  { %1570 = vrot.lane.b32.xlu0 %v1540_v61, %s3930_s27 }
 0x235   :  { %1588 = vrot.lane.b32.xlu1 %v1545_v8, %s3929_s6 }
 0x236   :  { %1586 = vrot.lane.b32.xlu0 %v1544_v40, %s3929_s6 }
 0x2ac   :  { %v4751_v43 = vpop.f32.mrb[4].mxu1 }
 0x2ad   :  { %v4753_v22 = vpop.f32.mrb[5].mxu1 }
 0x2b0   :  { %v4755_v1 = vpop.f32.mrb[6].mxu1 }
 0x2b1   :  { %v4757_v4 = vpop.f32.mrb[7].mxu1 }
 0x2b4   :  { %v3382_v58 = vpop.f32.mrb[8].mxu1 }
 0x2b5   :  { %v3143_v6 = vmul.f32 -1.442695, %v3382_v58  ;;  %v1133_v44 = vpop.f32.mrb[9].mxu1 }
 0x2b6   :  { %v3142_v38 = vmul.f32 -1.442695, %v1133_v44 }
 0x2b7   :  { %3765 = vpow2.f32 %v3143_v6 }
 0x2b8   :  { %3767 = vpow2.f32 %v3142_v38 }
 0x2ba   :  { %v3385_v32 = vpop.f32.mrb[10].mxu1 }
 0x2bb   :  { %v3145_v50 = vmul.f32 -1.442695, %v3385_v32  ;;  %v1143_v59 = vpop.f32.mrb[11].mxu1 }
 0x2bc   :  { %v3144_v31 = vmul.f32 -1.442695, %v1143_v59 }
 0x2c1   :  { %v3766_v9 = vpop.eup %3765 }
 0x2c2   :  { %v3768_v53 = vpop.eup %3767  ;;  %v1165_v13 = vadd.f32 1.0, %v3766_v9 }
 0x2c3   :  { %v1164_v46 = vadd.f32 1.0, %v3768_v53 }
 0x2c4   :  { %3769 = vrcp.f32 %v1165_v13 }
 0x2c5   :  { %3771 = vrcp.f32 %v1164_v46 }
 0x2c6   :  { %3773 = vpow2.f32 %v3145_v50  ;;  %v1606_v50 = vld [vmem:[%s5197_s7] sm:$0xff] }
 0x2c7   :  { %3775 = vpow2.f32 %v3144_v31 }
 0x2ce   :  { %v3770_v61 = vpop.eup %3769 }
 0x2cf   :  { %v3772_v8 = vpop.eup %3771  ;;  %v1177_v42 = vmul.f32 %v3770_v61, %v3382_v58  ;;  %v3154_v58 = vld [vmem:[%s5199_s9 + $0x10] sm:$0xff] }
 0x2d0   :  { %v1176_v40 = vmul.f32 %v3772_v8, %v1133_v44  ;;  %v3774_v37 = vpop.eup %3773  ;;  %v3155_v44 = vld [vmem:[%s5199_s9 + $0x18] sm:$0xff] }
 0x2d1   :  { %v3776_v19 = vpop.eup %3775  ;;  %v1167_v6 = vadd.f32 1.0, %v3774_v37  ;;  %v3578_v31 = vpack.c.bf16 %v3155_v44, %v3154_v58 }
 0x2d2   :  { %3390 = vmatprep.mubr.msk.f32.mxu0 %vm767_vm2, %v1176_v40  ;;  %v1166_v38 = vadd.f32 1.0, %v3776_v19 }
 0x2d3   :  { %3391 = vmatmul.mubr.msk.f32.vlgmr.msra.gmra.mrb[2].mxu0 %vm767_vm2, %v1177_v42  ;;  %3777 = vrcp.f32 %v1167_v6  ;;  %3579 = vmatprep.subr.bf16.mxu1 %v3578_v31 }
 0x2d4   :  { %3779 = vrcp.f32 %v1166_v38  ;;  %3581 = vmatpush3.bf16.msra.mxu1 %v3578_v31  ;;  %v1609_v31 = vld [vmem:[%s5197_s7 + $0x18] sm:$0xff] }
 0x2dd   :  { %v3778_v9 = vpop.eup %3777 }
 0x2de   :  { %v3780_v53 = vpop.eup %3779  ;;  %v1179_v46 = vmul.f32 %v3778_v9, %v3385_v32  ;;  %v1607_v32 = vld [vmem:[%s5197_s7 + $0x8] sm:$0xff] }
 0x2df   :  { %v1178_v13 = vmul.f32 %v3780_v53, %v1143_v59  ;;  %v3586_v59 = vpack.c.bf16 %v1607_v32, %v1606_v50  ;;  %v1608_v50 = vld [vmem:[%s5197_s7 + $0x10] sm:$0xff] }
 0x2e1   :  { %3393 = vmatprep.mubr.msk.f32.mxu0 %vm767_vm2, %v1178_v13  ;;  %3587 = vmatprep.subr.bf16.mxu1 %v3586_v59 }
 0x2e2   :  { %3394 = vmatmul.mubr.msk.f32.gmra.mrb[4].mxu0 %vm767_vm2, %v1179_v46  ;;  %v1551_v46 = vpop.permute.xlu0 %1550 }
 0x3a6   :  { %v3392_v61 = vpop.f32.mrb[2].mxu0 }
 0x3a7   :  { %v3151_v8 = vmul.f32 -1.442695, %v3392_v61  ;;  %v1260_v40 = vpop.f32.mrb[3].mxu0 }
 0x3a8   :  { %v3150_v42 = vmul.f32 -1.442695, %v1260_v40 }
 0x3a9   :  { %3781 = vpow2.f32 %v3151_v8  ;;  %v1553_v8 = vpop.permute.xlu1 %1552 }
 0x3aa   :  { %3783 = vpow2.f32 %v3150_v42 }
 0x3b3   :  { %v3782_v37 = vpop.eup %3781 }
 0x3b4   :  { %v3784_v19 = vpop.eup %3783  ;;  %v1292_v6 = vadd.f32 1.0, %v3782_v37 }
 0x3b5   :  { %v1291_v38 = vadd.f32 1.0, %v3784_v19  ;;  %v3395_v9 = vpop.f32.mrb[4].mxu0  ;;  %v3590_v19 = vpack.c.bf16 %v1609_v31, %v1608_v50 }
 0x3b6   :  { %3785 = vrcp.f32 %v1292_v6  ;;  %v3153_v53 = vmul.f32 -1.442695, %v3395_v9  ;;  %v1270_v13 = vpop.f32.mrb[5].mxu0  ;;  %v1567_v6 = vpop.permute.xlu0 %1566 }
 0x3b7   :  { %3787 = vrcp.f32 %v1291_v38  ;;  %v3152_v58 = vmul.f32 -1.442695, %v1270_v13  ;;  %v1610_v38 = vld [vmem:[%s5197_s7 + $0x20] sm:$0xff] }
 0x3b8   :  { %3789 = vpow2.f32 %v3153_v53  ;;  %v1611_v53 = vld [vmem:[%s5197_s7 + $0x28] sm:$0xff] }
 0x3b9   :  { %3791 = vpow2.f32 %v3152_v58  ;;  %v1569_v58 = vpop.permute.xlu1 %1568  ;;  %v3594_v56 = vpack.c.bf16 %v1611_v53, %v1610_v38 }
 0x3ba   :  { %v1583_v31 = vpop.permute.xlu0 %1582 }
 0x3be   :  { %v1555_v38 = vpop.permute.xlu0 %1554 }
 0x3c0   :  { %v3786_v44 = vpop.eup %3785 }
 0x3c1   :  { %v3788_v32 = vpop.eup %3787  ;;  %v1304_v37 = vmul.f32 %v3786_v44, %v3392_v61  ;;  %v1612_v61 = vld [vmem:[%s5197_s7 + $0x30] sm:$0xff] }
 0x3c2   :  { %v1303_v42 = vmul.f32 %v3788_v32, %v1260_v40  ;;  %v1613_v40 = vld [vmem:[%s5197_s7 + $0x38] sm:$0xff]  ;;  %v3790_v44 = vpop.eup %3789  ;;  %v1571_v63 = vpop.permute.xlu0 %1570 }
 0x3c3   :  { %v3792_v50 = vpop.eup %3791  ;;  %v1294_v32 = vadd.f32 1.0, %v3790_v44 }
 0x3c4   :  { %3400 = vmatprep.mubr.msk.f32.mxu1 %vm767_vm2, %v1303_v42  ;;  %v1293_v42 = vadd.f32 1.0, %v3792_v50 }
 0x3c5   :  { %3401 = vmatmul.mubr.msk.f32.vlgmr.msra.gmra.mrb[12].mxu1 %vm767_vm2, %v1304_v37  ;;  %v3598_v37 = vpack.c.bf16 %v1613_v40, %v1612_v61  ;;  %3793 = vrcp.f32 %v1294_v32  ;;  %v1595_v40 = vsel %vm767_vm2, %v4687_v35, %v1553_v8 }
 0x3c6   :  { %3589 = vmatpush3.bf16.msra.mxu1 %v3586_v59  ;;  %v1585_v59 = vpop.permute.xlu1 %1584  ;;  %3795 = vrcp.f32 %v1293_v42  ;;  %v1587_v32 = vpop.permute.xlu0 %1586 }
 0x3c7   :  { %3591 = vmatprep.subr.bf16.mxu1 %v3590_v19 }
 0x3ca   :  { %3593 = vmatpush3.bf16.msra.mxu1 %v3590_v19  ;;  %v1557_v53 = vpop.permute.xlu1 %1556  ;;  %v1594_v19 = vsel %vm767_vm2, %v4689_v16, %v1551_v46  ;;  %v1596_v16 = vsel %vm767_vm2, %v4703_v36, %v1555_v38  ;;  %v1435_v36 = vld [vmem:[%s5200_s10] sm:$0xff] }
 0x3cb   :  { %3595 = vmatprep.subr.bf16.mxu1 %v3594_v56  ;;  %v1598_v61 = vsel %vm769_vm3, %v1594_v19, %v1567_v6  ;;  %v1597_v35 = vsel %vm767_vm2, %v4700_v39, %v1557_v53 }
 0x3ce   :  { %3597 = vmatpush3.bf16.msra.mxu1 %v3594_v56  ;;  %v1573_v44 = vpop.permute.xlu1 %1572  ;;  %v1602_v56 = vsel %vm771_vm4, %v1598_v61, %v1583_v31 }
 0x3cf   :  { %3599 = vmatprep.subr.bf16.mxu1 %v3598_v37  ;;  %v3794_v47 = vpop.eup %3793  ;;  %v1601_v46 = vsel %vm769_vm3, %v1597_v35, %v1573_v44 }
 0x3d0   :  { %v3796_v57 = vpop.eup %3795  ;;  %v1306_v50 = vmul.f32 %v3794_v47, %v3395_v9  ;;  %v1600_v9 = vsel %vm769_vm3, %v1596_v16, %v1571_v63  ;;  %v1436_v63 = vld [vmem:[%s5200_s10 + $0x8] sm:$0xff]  ;;  %s3938_s10 = smov 113  }
 0x3d1   :  { %v1305_v48 = vmul.f32 %v3796_v57, %v1270_v13  ;;  %v1599_v57 = vsel %vm769_vm3, %v1595_v40, %v1569_v58  ;;  %v1604_v13 = vsel %vm771_vm4, %v1600_v9, %v1587_v32  ;;  %v3582_v39 = vpack.c.bf16 %v1436_v63, %v1435_v36 }
 0x3d2   :  { %3601 = vmatpush3.bf16.msra.mxu1 %v3598_v37  ;;  %v1603_v47 = vsel %vm771_vm4, %v1599_v57, %v1585_v59 }
 0x3d3   :  { %3602 = vmatprep.subr.bf16.mxu1 %v5249_v29  ;;  %3403 = vmatprep.mubr.msk.f32.mxu1 %vm767_vm2, %v1305_v48  ;;  %v1589_v48 = vpop.permute.xlu1 %1588 }
 0x3d4   :  { %3404 = vmatmul.mubr.msk.f32.gmra.mrb[14].mxu1 %vm767_vm2, %v1306_v50  ;;  %v1605_v8 = vsel %vm771_vm4, %v1601_v46, %v1589_v48  ;;  %3583 = vmatprep.subr.bf16.mxu0 %v3582_v39 }
 0x3d5   :  { %3432 = vmatprep.mubr.msk.f32.mxu1 %vm773_vm5, %v1602_v56  ;;  %3585 = vmatpush3.bf16.msra.mxu0 %v3582_v39 }
 0x3d6   :  { %3608 = vmatprep.subr.bf16.mxu0 %v5249_v29 }
 0x3d8   :  { %3433 = vmatmul.mubr.msk.f32.vlgmr.msra.gmra.mrb[16].mxu1 %vm773_vm5, %v1603_v47 }
 0x3d9   :  { %3435 = vmatprep.mubr.msk.f32.mxu1 %vm773_vm5, %v1604_v13 }
 0x3dc   :  { %3436 = vmatmul.mubr.msk.f32.gmra.mrb[18].mxu1 %vm773_vm5, %v1605_v8 }
 0x3dd   :  { %3446 = vmatprep.mubr.msk.f32.mxu1 %vm3926_vm0, %v5241_v60 }
 0x498   :  { %v3402_v6 = vpop.f32.mrb[12].mxu1 }
 0x499   :  { %v3161_v58 = vmul.f32 -1.442695, %v3402_v6  ;;  %v1388_v31 = vpop.f32.mrb[13].mxu1 }
 0x49a   :  { %v3160_v42 = vmul.f32 -1.442695, %v1388_v31 }
 0x49b   :  { %3797 = vpow2.f32 %v3161_v58 }
 0x49c   :  { %3799 = vpow2.f32 %v3160_v42 }
 0x4a5   :  { %v3798_v37 = vpop.eup %3797 }
 0x4a6   :  { %v3800_v59 = vpop.eup %3799  ;;  %v1420_v38 = vadd.f32 1.0, %v3798_v37 }
 0x4a7   :  { %v1419_v53 = vadd.f32 1.0, %v3800_v59  ;;  %v3405_v19 = vpop.f32.mrb[14].mxu1 }
 0x4a8   :  { %3801 = vrcp.f32 %v1420_v38  ;;  %v3163_v44 = vmul.f32 -1.442695, %v3405_v19  ;;  %v1398_v50 = vpop.f32.mrb[15].mxu1 }
 0x4a9   :  { %3803 = vrcp.f32 %v1419_v53  ;;  %v3162_v61 = vmul.f32 -1.442695, %v1398_v50 }
 0x4aa   :  { %3805 = vpow2.f32 %v3163_v44 }
 0x4ab   :  { %3807 = vpow2.f32 %v3162_v61  ;;  %v3434_v40 = vpop.f32.mrb[16].mxu1 }
 0x4ac   :  { %v1692_v57 = vpop.f32.mrb[17].mxu1 }
 0x4af   :  { %v3437_v9 = vpop.f32.mrb[18].mxu1 }
 0x4b0   :  { %v1702_v48 = vpop.f32.mrb[19].mxu1 }
 0x4b2   :  { %v3802_v56 = vpop.eup %3801 }
 0x4b3   :  { %v3804_v32 = vpop.eup %3803  ;;  %v1432_v47 = vmul.f32 %v3802_v56, %v3402_v6 }
 0x4b4   :  { %v1431_v16 = vmul.f32 %v3804_v32, %v1388_v31  ;;  %v3806_v13 = vpop.eup %3805 }
 0x4b5   :  { %v3808_v35 = vpop.eup %3807  ;;  %v1422_v46 = vadd.f32 1.0, %v3806_v13 }
 0x4b6   :  { %3410 = vmatprep.mubr.msk.f32.mxu0 %vm767_vm2, %v1431_v16  ;;  %v1421_v8 = vadd.f32 1.0, %v3808_v35 }
 0x4b7   :  { %3411 = vmatmul.mubr.msk.f32.vlgmr.msra.gmra.mrb[6].mxu0 %vm767_vm2, %v1432_v47  ;;  %3809 = vrcp.f32 %v1422_v46 }
 0x4b8   :  { %3811 = vrcp.f32 %v1421_v8 }
 0x4c1   :  { %v3810_v36 = vpop.eup %3809 }
 0x4c2   :  { %v3812_v63 = vpop.eup %3811  ;;  %v1434_v58 = vmul.f32 %v3810_v36, %v3405_v19 }
 0x4c3   :  { %v1433_v39 = vmul.f32 %v3812_v63, %v1398_v50 }
 0x4c5   :  { %3413 = vmatprep.mubr.msk.f32.mxu0 %vm767_vm2, %v1433_v39 }
 0x4c6   :  { %3414 = vmatmul.mubr.msk.f32.gmra.mrb[8].mxu0 %vm767_vm2, %v1434_v58 }
 0x4c7   :  { %3469 = vmatprep.mubr.msk.f32.mxu0 %vm3926_vm0, %v5241_v60 }
 0x58a   :  { %v3412_v6 = vpop.f32.mrb[6].mxu0 }
 0x58b   :  { %v4833_v31 = vmul.f32 %v3434_v40, %v3412_v6  ;;  %v1515_v42 = vpop.f32.mrb[7].mxu0 }
 0x58c   :  { %v4835_v37 = vmul.f32 %v1692_v57, %v1515_v42 }
 0x58d   :  { %v1716_v59 = vmul.f32 %v4751_v43, %v4833_v31 }
 0x58e   :  { %v1715_v38 = vmul.f32 %v4835_v37, %v4753_v22 }
 0x58f   :  { %v1722_v53 = vsel %vm767_vm2, %v1716_v59, 0.0 }
 0x590   :  { %1723 = vadd.xlane.f32.xlu1 %v1722_v53  ;;  %v1719_v19 = vsel %vm767_vm2, %v1715_v38, 0.0 }
 0x591   :  { %1720 = vadd.xlane.f32.xlu0 %v1719_v19 }
 0x599   :  { %v3415_v44 = vpop.f32.mrb[8].mxu0 }
 0x59a   :  { %v4843_v50 = vmul.f32 %v3437_v9, %v3415_v44  ;;  %v1525_v61 = vpop.f32.mrb[9].mxu0 }
 0x59b   :  { %v4845_v56 = vmul.f32 %v1702_v48, %v1525_v61 }
 0x59c   :  { %v1718_v22 = vmul.f32 %v4755_v1, %v4843_v50 }
 0x59d   :  { %v1717_v40 = vmul.f32 %v4845_v56, %v4757_v4 }
 0x59e   :  { %v1728_v32 = vsel %vm767_vm2, %v1718_v22, 0.0 }
 0x59f   :  { %v1725_v43 = vsel %vm767_vm2, %v1717_v40, 0.0 }
 0x5a0   :  { %1726 = vadd.xlane.f32.xlu0 %v1725_v43 }
 0x5a4   :  { %1729 = vadd.xlane.f32.xlu0 %v1728_v32 }
 0x61d   :  { %v1724_v16 = vpop.xlane.xlu1 %1723 }
 0x61e   :  { %v1721_v57 = vpop.xlane.xlu0 %1720  ;;  %v1732_v9 = vsel %vm657_vm12, %v1724_v16, -1e+30 }
 0x61f   :  { %v1731_v4 = vsel %vm5250_vm15, %v1721_v57, -1e+30  ;;  %v1736_v1 = vsel %vm859_vm9, %v1732_v9, -inf }
 0x620   :  { %v1735_v13 = vsel %vm859_vm9, %v1731_v4, -inf }
 0x621   :  { %v1739_v63 = vmax.f32 %v1735_v13, %v1736_v1 }
 0x62d   :  { %v1727_v47 = vpop.xlane.xlu0 %1726 }
 0x62e   :  { %v1733_v48 = vsel %vm658_vm6, %v1727_v47, -1e+30 }
 0x62f   :  { %v1737_v8 = vsel %vm859_vm9, %v1733_v48, -inf }
 0x631   :  { %v1730_v35 = vpop.xlane.xlu0 %1729 }
 0x632   :  { %v1734_v46 = vsel %vm659_vm14, %v1730_v35, -1e+30 }
 0x633   :  { %v1738_v36 = vsel %vm859_vm9, %v1734_v46, -inf }
 0x634   :  { %v1740_v39 = vmax.f32 %v1737_v8, %v1738_v36 }
 0x636   :  { %v1741_v58 = vmax.f32 %v1739_v63, %v1740_v39 }
 0x638   :  { %v1742_v6 = vrot.slane %v1741_v58, 4 }
 0x63a   :  { %v1743_v42 = vmax.f32 %v1741_v58, %v1742_v6 }
 0x63c   :  { %v1744_v59 = vrot.slane %v1743_v42, 2 }
 0x63e   :  { %v1745_v38 = vmax.f32 %v1743_v42, %v1744_v59 }
 0x640   :  { %v1746_v53 = vrot.slane %v1745_v38, 1 }
 0x642   :  { %v1747_v19 = vmax.f32 %v1745_v38, %v1746_v53 }
 0x644   :  { %v1749_v44 = vmul.f32 %v4604_v51, %v1747_v19  ;;  %v1748_v61 = vmul.f32 %v4224_v54, %v1747_v19  ;;  %v1751_v22 = vmul.f32 %v4636_v52, %v1747_v19  ;;  %v1750_v32 = vmul.f32 %v4617_v10, %v1747_v19 }
 0x646   :  { %v1755_v40 = vsel %vm859_vm9, %v1749_v44, 0.0  ;;  %v1752_v43 = vsel %vm859_vm9, %v1748_v61, 0.0  ;;  %v1761_v9 = vsel %vm859_vm9, %v1751_v22, 0.0  ;;  %v1758_v4 = vsel %vm859_vm9, %v1750_v32, 0.0 }
 0x647   :  { %1756 = vadd.xlane.f32.xlu0 %v1755_v40  ;;  %1753 = vadd.xlane.f32.xlu1 %v1752_v43 }
 0x64b   :  { %1762 = vadd.xlane.f32.xlu0 %v1761_v9  ;;  %1759 = vadd.xlane.f32.xlu1 %v1758_v4 }
 0x6d4   :  { %v1757_v48 = vpop.xlane.xlu0 %1756  ;;  %v1754_v1 = vpop.xlane.xlu1 %1753 }
 0x6d5   :  { %v1765_v13 = vsub.f32 %v1724_v16, %v1757_v48  ;;  %v1764_v46 = vsub.f32 %v1721_v57, %v1754_v1 }
 0x6d7   :  { %v1770_v8 = vmul.f32 1.442695, %v1765_v13  ;;  %v1768_v36 = vmul.f32 1.442695, %v1764_v46 }
 0x6d8   :  { %v1763_v63 = vpop.xlane.xlu0 %1762  ;;  %v1760_v39 = vpop.xlane.xlu1 %1759 }
 0x6d9   :  { %3813 = vpow2.f32 %v1770_v8  ;;  %v1767_v58 = vsub.f32 %v1730_v35, %v1763_v63  ;;  %v1766_v6 = vsub.f32 %v1727_v47, %v1760_v39 }
 0x6da   :  { %3815 = vpow2.f32 %v1768_v36 }
 0x6db   :  { %v1774_v42 = vmul.f32 1.442695, %v1767_v58  ;;  %v1772_v59 = vmul.f32 1.442695, %v1766_v6 }
 0x6dd   :  { %3817 = vpow2.f32 %v1774_v42 }
 0x6de   :  { %3819 = vpow2.f32 %v1772_v59 }
 0x6e3   :  { %v3814_v38 = vpop.eup %3813 }
 0x6e4   :  { %v3816_v53 = vpop.eup %3815  ;;  %v1777_v19 = vmul.f32 %v3814_v38, %v4644_v62 }
 0x6e5   :  { %v1776_v44 = vmul.f32 %v3816_v53, %v4623_v33 }
 0x6e6   :  { %3821 = vrsqrt.f32 %v1777_v19  ;;  %vm1789_vm1 = vcmp.eq.f32.partialorder %v1777_v19, inf  ;;  %v1792_v32 = vand.u32 2147483648, %v1777_v19  ;;  %vm1791_vm13 = vcmp.eq.f32.partialorder %v1777_v19, 0.0 }
 0x6e7   :  { %v3818_v57 = vpop.eup %3817  ;;  %3823 = vrsqrt.f32 %v1776_v44  ;;  %vm1782_vm10 = vcmp.eq.f32.partialorder %v1776_v44, inf  ;;  %v1785_v9 = vand.u32 2147483648, %v1776_v44  ;;  %vm1784_vm8 = vcmp.eq.f32.partialorder %v1776_v44, 0.0 }
 0x6e8   :  { %v3820_v16 = vpop.eup %3819  ;;  %v1779_v61 = vmul.f32 %v3818_v57, %v4670_v7 }
 0x6e9   :  { %v1778_v35 = vmul.f32 %v3820_v16, %v4648_v21 }
 0x6ea   :  { %3825 = vrsqrt.f32 %v1779_v61  ;;  %vm1803_vm11 = vcmp.eq.f32.partialorder %v1779_v61, inf  ;;  %v1806_v6 = vand.u32 2147483648, %v1779_v61  ;;  %vm1805_vm15 = vcmp.eq.f32.partialorder %v1779_v61, 0.0 }
 0x6eb   :  { %3827 = vrsqrt.f32 %v1778_v35  ;;  %vm1796_vm7 = vcmp.eq.f32.partialorder %v1778_v35, inf  ;;  %v1799_v42 = vand.u32 2147483648, %v1778_v35 }
 0x6f0   :  { %v3822_v47 = vpop.eup %3821 }
 0x6f1   :  { %v3824_v40 = vpop.eup %3823  ;;  %v1788_v43 = vmul.f32 %v3822_v47, %v1777_v19 }
 0x6f2   :  { %v1781_v22 = vmul.f32 %v3824_v40, %v1776_v44  ;;  %v5251_v40 = vmov 0  }
 0x6f3   :  { %v1790_v4 = vsel %vm1789_vm1, %v1777_v19, %v1788_v43  ;;  %vm1798_vm1 = vcmp.eq.f32.partialorder %v1778_v35, 0.0 }
 0x6f4   :  { %v3826_v48 = vpop.eup %3825  ;;  %v1783_v1 = vsel %vm1782_vm10, %v1776_v44, %v1781_v22  ;;  %v1793_v13 = vsel %vm1791_vm13, %v1792_v32, %v1790_v4  ;;  %vm1828_vm10 = vcmask 7168   ;;  %vm5253_vm13 = vcmask 654336  }
 0x6f5   :  { %v3828_v46 = vpop.eup %3827  ;;  %v1786_v8 = vsel %vm1784_vm8, %v1785_v9, %v1783_v1  ;;  %v1809_v36 = vmul.f32 %v1793_v13, %v4833_v31  ;;  %v1802_v63 = vmul.f32 %v3826_v48, %v1779_v61 }
 0x6f6   :  { %v1808_v39 = vmul.f32 %v1786_v8, %v4835_v37  ;;  %v1795_v58 = vmul.f32 %v3828_v46, %v1778_v35 }
 0x6f7   :  { %v1804_v59 = vsel %vm1803_vm11, %v1779_v61, %v1802_v63 }
 0x6f8   :  { %v3711_v38 = vpack.i.bf16 %v1809_v36, %v1808_v39  ;;  %v1797_v53 = vsel %vm1796_vm7, %v1778_v35, %v1795_v58  ;;  %v1807_v57 = vsel %vm1805_vm15, %v1806_v6, %v1804_v59  ;;  %v1984_v59 = vld [vmem:[%s5201_s11 + $0x28] sm:$0xff] }
 0x6f9   :  { %v1800_v16 = vsel %vm1798_vm1, %v1799_v42, %v1797_v53  ;;  %v1811_v47 = vmul.f32 %v1807_v57, %v4843_v50  ;;  %v1983_v42 = vld [vmem:[%s5201_s11 + $0x20] sm:$0xff]  ;;  %v1985_v57 = vld [vmem:[%s5201_s11 + $0x30] sm:$0xff] }
 0x6fa   :  { %3712 = vrot.lane.b32.xlu1 %v3711_v38, %s3938_s10  ;;  %v1810_v31 = vmul.f32 %v1800_v16, %v4845_v56  ;;  %v3615_v38 = vpack.c.bf16 %v1984_v59, %v1983_v42  ;;  %v1986_v16 = vld [vmem:[%s5201_s11 + $0x38] sm:$0xff]  ;;  %v5254_v42 = vld [vmem:[#allocation6_spill] sm:$0xff] }
 0x6fc   :  { %v3716_v37 = vpack.i.bf16 %v1811_v47, %v1810_v31  ;;  %v3618_v31 = vpack.c.bf16 %v1986_v16, %v1985_v57  ;;  %v5255_v16 = vld [vmem:[#allocation10_spill] sm:$0xff] }
 0x6fe   :  { %3717 = vrot.lane.b32.xlu0 %v3716_v37, %s3938_s10 }
 0x723   :  { %1833 = vxpose.xlu1.b32.start [1/4] (short) (narrow) %v4224_v54, 8 }
 0x727   :  { %1834 = vxpose.xlu1.b32.cont [2/4] (short) (narrow) %v4604_v51, 8 }
 0x72b   :  { %1835 = vxpose.xlu1.b32.cont [3/4] (short) (narrow) %v4617_v10, 8 }
 0x72f   :  { %1836 = vxpose.xlu1.b32.end [4/4] (short) (narrow) %v4636_v52, 8 }
 0x74d   :  { %3732 = vset.pattern.permute.xlu1 %v5251_v40 }
 0x76c   :  { %v3713_v50 = vpop.permute.xlu1 %3712 }
 0x76d   :  { %v3715_v43 = vunpack.i.h.bf16 %v3713_v50  ;;  %v3714_v22 = vunpack.i.l.bf16 %v3713_v50  ;;  %v1987_v50 = vld [vmem:[%s5201_s11 + $0x40] sm:$0xff] }
 0x76f   :  { %v1830_v32 = vsel %vm1828_vm10, %v1777_v19, %v3715_v43  ;;  %v1829_v56 = vsel %vm1828_vm10, %v1776_v44, %v3714_v22  ;;  %v1988_v43 = vld [vmem:[%s5201_s11 + $0x48] sm:$0xff] }
 0x770   :  { %v3603_v9 = vpack.c.bf16 %v1830_v32, %v1829_v56  ;;  %v3718_v4 = vpop.permute.xlu0 %3717  ;;  %v3621_v22 = vpack.c.bf16 %v1988_v43, %v1987_v50  ;;  %v2232_v56 = vld [vmem:[%s5203_s13] sm:$0xff] }
 0x771   :  { %v3720_v48 = vunpack.i.h.bf16 %v3718_v4  ;;  %v3719_v1 = vunpack.i.l.bf16 %v3718_v4 }
 0x772   :  { %3604 = vmatpush3.bf16.msra.mxu1 %v3603_v9 }
 0x773   :  { %v1832_v13 = vsel %vm1828_vm10, %v1779_v61, %v3720_v48  ;;  %v1831_v46 = vsel %vm1828_vm10, %v1778_v35, %v3719_v1  ;;  %3605 = vmatprep.subr.bf16.mxu1 %v5249_v29  ;;  %v1979_v61 = vld [vmem:[%s5201_s11] sm:$0xff]  ;;  %v1980_v35 = vld [vmem:[%s5201_s11 + $0x8] sm:$0xff] }
 0x774   :  { %v3606_v8 = vpack.c.bf16 %v1832_v13, %v1831_v46  ;;  %v3609_v58 = vpack.c.bf16 %v1980_v35, %v1979_v61  ;;  %v5252_v1 = vld [vmem:[#allocation5_spill] sm:$0xff] }
 0x776   :  { %3607 = vmatpush3.bf16.msra.mxu1 %v3606_v8  ;;  %3610 = vmatpush3.bf16.msra.mxu0 %v3609_v58 }
 0x777   :  { %3611 = vmatprep.subr.bf16.mxu0 %v5249_v29 }
 0x7a3   :  { %v4897_v36 = vpop.trf.xlu1 }
 0x7a4   :  { %3447 = vmatmul.mubr.msk.f32.vlgmr.msra.gmra.mrb[20].mxu1 %vm769_vm3, %v4897_v36 }
 0x7a5   :  { %3474 = vmatprep.mubr.msk.f32.mxu1 %vm859_vm9, %v4172_v18  ;;  %v1981_v18 = vld [vmem:[%s5201_s11 + $0x10] sm:$0xff] }
 0x877   :  { %v1934_v19 = vpop.f32.mrb[20].mxu1 }
 0x878   :  { %v1938_v44 = vmax.f32 %v1934_v19, 1e-30  ;;  %v3448_v63 = vpop.f32.mrb[21].mxu1 }
 0x87a   :  { %3829 = vrsqrt.f32 %v1938_v44 }
 0x884   :  { %v3830_v39 = vpop.eup %3829 }
 0x885   :  { %1942 = vperm.xlu0 %3721, %v3830_v39  }
 0x889   :  { %1947 = vrot.lane.b32.xlu0 %v4595_v3, %s3938_s10  ;;  %v1982_v3 = vld [vmem:[%s5201_s11 + $0x18] sm:$0xff]  ;;  %s3942_s11 = smov 47  }
 0x88a   :  { %v3612_v6 = vpack.c.bf16 %v1982_v3, %v1981_v18 }
 0x88c   :  { %3613 = vmatpush3.bf16.msra.mxu0 %v3612_v6 }
 0x88d   :  { %3614 = vmatprep.subr.bf16.mxu0 %v5249_v29 }
 0x890   :  { %3616 = vmatpush3.bf16.msra.mxu0 %v3615_v38 }
 0x891   :  { %3617 = vmatprep.subr.bf16.mxu0 %v5249_v29 }
 0x894   :  { %3619 = vmatpush3.bf16.msra.mxu0 %v3618_v31  ;;  %v5256_v31 = vld [vmem:[#allocation8_spill] sm:$0xff] }
 0x895   :  { %3620 = vmatprep.subr.bf16.mxu0 %v5249_v29 }
 0x898   :  { %3622 = vmatpush3.bf16.msra.mxu0 %v3621_v22  ;;  %v5257_v22 = vld [vmem:[#allocation7_spill] sm:$0xff] }
 0x899   :  { %3488 = vmatprep.subr.mxu0 %v2232_v56 }
 0x904   :  { %v1943_v53 = vpop.permute.xlu0 %1942 }
 0x905   :  { %v1945_v47 = vmul.f32 %v1943_v53, %v1934_v19 }
 0x908   :  { %v1948_v37 = vpop.permute.xlu0 %1947 }
 0x909   :  { %v1950_v40 = vadd.f32 %v1948_v37, %v1945_v47 }
 0x90b   :  { %1956 = vrot.lane.b32.xlu0 %v1950_v40, %s3939_s30  ;;  %v1951_v32 = vmul.f32 %v1950_v40, %v4082_v23  ;;  %v1952_v9 = vmul.f32 %v1950_v40, %v4091_v27  ;;  %v1953_v4 = vmul.f32 %v1950_v40, %v4084_v24  ;;  %v1954_v48 = vmul.f32 %v1950_v40, %v4093_v28 }
 0x90f   :  { %1960 = vrot.lane.b32.xlu0 %v1951_v32, %s3940_s0 }
 0x913   :  { %1964 = vrot.lane.b32.xlu0 %v1952_v9, %s3941_s19 }
 0x917   :  { %1968 = vrot.lane.b32.xlu0 %v1953_v4, %s3942_s11 }
 0x91b   :  { %1972 = vrot.lane.b32.xlu0 %v1954_v48, %s3943_s20 }
 0x97d   :  { %v1957_v23 = vpop.permute.xlu0 %1956 }
 0x97e   :  { %3472 = vmatprep.subr.mxu1 %v1957_v23 }
 0x97f   :  { %3473 = vmatpush3.msra.mxu1 %v1957_v23 }
 0x980   :  { %3475 = vmatmul.mubr.msk.f32.vlgmr.msra.gmra.mrb[22].mxu1 %vm859_vm9, %v4163_v14 }
 0x981   :  { %3477 = vmatprep.mubr.msk.f32.mxu1 %vm859_vm9, %v4169_v17  ;;  %v1961_v27 = vpop.permute.xlu0 %1960 }
 0x982   :  { %v1975_v13 = vsel %vm767_vm2, %v1957_v23, %v1961_v27  ;;  %v5258_v23 = vld [vmem:[#allocation9_spill] sm:$0xff] }
 0x984   :  { %3478 = vmatmul.mubr.msk.f32.gmra.mrb[24].mxu1 %vm859_vm9, %v5252_v1 }
 0x985   :  { %3482 = vmatprep.mubr.msk.f32.mxu1 %vm859_vm9, %v4224_v54  ;;  %v1965_v24 = vpop.permute.xlu0 %1964 }
 0x986   :  { %v1976_v46 = vsel %vm769_vm3, %v1975_v13, %v1965_v24  ;;  %v5259_v24 = vld [vmem:[#allocation11_spill] sm:$0xff] }
 0x989   :  { %v1969_v28 = vpop.permute.xlu0 %1968 }
 0x98a   :  { %v1977_v8 = vsel %vm771_vm4, %v1976_v46, %v1969_v28 }
 0x98d   :  { %v1973_v19 = vpop.permute.xlu0 %1972 }
 0x98e   :  { %v1978_v14 = vsel %vm773_vm5, %v1977_v8, %v1973_v19 }
 0x98f   :  { %3470 = vmatmul.mubr.msk.f32.vlgmr.msra.gmra.mrb[10].mxu0 %vm5253_vm13, %v1978_v14 }
 0x990   :  { %3490 = vmatprep.mubr.msk.f32.mxu0 %vm859_vm9, %v4639_v15  ;;  %3489 = vmatpush3.msra.mxu0 %v2232_v56 }
 0x993   :  { %3491 = vmatmul.mubr.msk.f32.vlgmr.msra.gmra.mrb[12].mxu0 %vm859_vm9, %v4654_v5 }
 0x994   :  { %3493 = vmatprep.mubr.msk.f32.mxu0 %vm859_vm9, %v4658_v34 }
 0x997   :  { %3494 = vmatmul.mubr.msk.f32.gmra.mrb[14].mxu0 %vm859_vm9, %v4673_v12 }
 0xa53   :  { %v4968_v17 = vpop.f32.mrb[22].mxu1 }
 0xa54   :  { %v4970_v44 = vpop.f32.mrb[23].mxu1  ;;  %v2701_v63 = vmul.f32 %v4968_v17, %v4685_v30  ;;  %v2705_v12 = vmul.f32 %v4968_v17, %v4698_v41  ;;  %v2347_v30 = vld [vmem:[%s5204_s14 + $0x8] sm:$0xff] }
 0xa55   :  { %v2708_v15 = vmul.f32 %v4970_v44, %v4681_v11  ;;  %v2700_v39 = vmul.f32 %v4970_v44, %v4677_v25  ;;  %v2346_v11 = vld [vmem:[%s5204_s14] sm:$0xff]  ;;  %v2704_v61 = vmul.f32 %v4970_v44, %v4679_v55  ;;  %v2709_v25 = vmul.f32 %v4968_v17, %v4683_v2 }
 0xa56   :  { %2718 = vrot.lane.b32.xlu0 %v2701_v63, %s3928_s26  ;;  %v3623_v35 = vpack.c.bf16 %v2347_v30, %v2346_v11  ;;  %v3199_v11 = vld [vmem:[%s5204_s14 + $0x18] sm:$0xff]  ;;  %v2772_v30 = vld [vmem:[%s5202_s12] sm:$0xff] }
 0xa57   :  { %2748 = vrot.lane.b32.xlu1 %v2708_v15, %s3929_s6  ;;  %v4978_v5 = vpop.f32.mrb[24].mxu1 }
 0xa58   :  { %v4980_v34 = vpop.f32.mrb[25].mxu1  ;;  %v2703_v59 = vmul.f32 %v4978_v5, %v5254_v42  ;;  %v2707_v47 = vmul.f32 %v4978_v5, %v5255_v16  ;;  %v2711_v28 = vmul.f32 %v4978_v5, %v5259_v24 }
 0xa59   :  { %v2702_v37 = vmul.f32 %v4980_v34, %v5256_v31  ;;  %v2706_v32 = vmul.f32 %v4980_v34, %v5257_v22  ;;  %v2710_v27 = vmul.f32 %v4980_v34, %v5258_v23 }
 0xa5a   :  { %2734 = vrot.lane.b32.xlu0 %v2705_v12, %s3930_s27 }
 0xa5e   :  { %2716 = vrot.lane.b32.xlu0 %v2700_v39, %s3928_s26  ;;  %v3198_v39 = vld [vmem:[%s5204_s14 + $0x10] sm:$0xff] }
 0xa62   :  { %v4996_v41 = vpop.f32.mrb[10].mxu0  ;;  %2732 = vrot.lane.b32.xlu0 %v2704_v61, %s3930_s27  ;;  %v3627_v61 = vpack.c.bf16 %v3199_v11, %v3198_v39  ;;  %v2777_v39 = vld [vmem:[%s5202_s12 + $0x28] sm:$0xff] }
 0xa63   :  { %v3471_v58 = vpop.f32.mrb[11].mxu0  ;;  %3480 = vmatprep.subr.mxu1 %v4996_v41 }
 0xa64   :  { %3481 = vmatpush3.msra.mxu1 %v4996_v41  ;;  %3628 = vmatprep.subr.bf16.mxu0 %v3627_v61 }
 0xa65   :  { %3483 = vmatmul.mubr.msk.f32.vlgmr.msra.gmra.mrb[26].mxu1 %vm859_vm9, %v4604_v51  ;;  %3624 = vmatprep.subr.bf16.mxu1 %v3623_v35 }
 0xa66   :  { %3485 = vmatprep.mubr.msk.f32.mxu1 %vm859_vm9, %v4617_v10  ;;  %v3492_v55 = vpop.f32.mrb[12].mxu0  ;;  %2750 = vrot.lane.b32.xlu0 %v2709_v25, %s3929_s6 }
 0xa67   :  { %v3187_v18 = vmul.f32 -1.442695, %v3492_v55  ;;  %v2299_v3 = vpop.f32.mrb[13].mxu0  ;;  %3626 = vmatpush3.bf16.msra.mxu1 %v3623_v35  ;;  %v2773_v35 = vld [vmem:[%s5202_s12 + $0x8] sm:$0xff]  ;;  %3630 = vmatpush3.bf16.msra.mxu0 %v3627_v61 }
 0xa68   :  { %v3186_v6 = vmul.f32 -1.442695, %v2299_v3  ;;  %v3635_v58 = vpack.c.bf16 %v2773_v35, %v2772_v30 }
 0xa69   :  { %3831 = vpow2.f32 %v3187_v18  ;;  %3486 = vmatmul.mubr.msk.f32.gmra.mrb[28].mxu1 %vm859_vm9, %v4636_v52 }
 0xa6a   :  { %3833 = vpow2.f32 %v3186_v6  ;;  %v3495_v2 = vpop.f32.mrb[14].mxu0  ;;  %2722 = vrot.lane.b32.xlu0 %v2703_v59, %s3928_s26  ;;  %3636 = vmatprep.subr.bf16.mxu0 %v3635_v58 }
 0xa6b   :  { %v3189_v38 = vmul.f32 -1.442695, %v3495_v2  ;;  %v2309_v53 = vpop.f32.mrb[15].mxu0 }
 0xa6c   :  { %v3188_v57 = vmul.f32 -1.442695, %v2309_v53 }
 0xa6d   :  { %3835 = vpow2.f32 %v3189_v38 }
 0xa6e   :  { %3837 = vpow2.f32 %v3188_v57  ;;  %2738 = vrot.lane.b32.xlu0 %v2707_v47, %s3930_s27 }
 0xa72   :  { %2720 = vrot.lane.b32.xlu0 %v2702_v37, %s3928_s26 }
 0xa73   :  { %v3832_v40 = vpop.eup %3831 }
 0xa74   :  { %v3834_v50 = vpop.eup %3833  ;;  %v2331_v43 = vadd.f32 1.0, %v3832_v40 }
 0xa75   :  { %v2330_v56 = vadd.f32 1.0, %v3834_v50 }
 0xa76   :  { %3839 = vrcp.f32 %v2331_v43  ;;  %2736 = vrot.lane.b32.xlu0 %v2706_v32, %s3930_s27 }
 0xa77   :  { %v3836_v9 = vpop.eup %3835  ;;  %3841 = vrcp.f32 %v2330_v56 }
 0xa78   :  { %v3838_v4 = vpop.eup %3837  ;;  %v2333_v48 = vadd.f32 1.0, %v3836_v9 }
 0xa79   :  { %v2332_v1 = vadd.f32 1.0, %v3838_v4 }
 0xa7a   :  { %3843 = vrcp.f32 %v2333_v48  ;;  %2752 = vrot.lane.b32.xlu0 %v2710_v27, %s3929_s6 }
 0xa7b   :  { %3845 = vrcp.f32 %v2332_v1 }
 0xa7e   :  { %2754 = vrot.lane.b32.xlu0 %v2711_v28, %s3929_s6  ;;  %v2774_v28 = vld [vmem:[%s5202_s12 + $0x10] sm:$0xff] }
 0xa80   :  { %v3840_v13 = vpop.eup %3839 }
 0xa81   :  { %v3842_v46 = vpop.eup %3841  ;;  %v2343_v19 = vmul.f32 %v3840_v13, %v3492_v55  ;;  %v2775_v13 = vld [vmem:[%s5202_s12 + $0x18] sm:$0xff] }
 0xa82   :  { %v2342_v8 = vmul.f32 %v3842_v46, %v2299_v3 }
 0xa84   :  { %v3844_v14 = vpop.eup %3843  ;;  %3500 = vmatprep.mubr.msk.f32.mxu1 %vm767_vm2, %v2342_v8 }
 0xa85   :  { %v3846_v63 = vpop.eup %3845  ;;  %3501 = vmatmul.mubr.msk.f32.vlgmr.msra.gmra.mrb[30].mxu1 %vm767_vm2, %v2343_v19  ;;  %v2345_v12 = vmul.f32 %v3844_v14, %v3495_v2 }
 0xa86   :  { %v2344_v15 = vmul.f32 %v3846_v63, %v2309_v53  ;;  %v3639_v63 = vpack.c.bf16 %v2775_v13, %v2774_v28 }
 0xa88   :  { %3503 = vmatprep.mubr.msk.f32.mxu1 %vm767_vm2, %v2344_v15 }
 0xa89   :  { %3504 = vmatmul.mubr.msk.f32.gmra.mrb[32].mxu1 %vm767_vm2, %v2345_v12  ;;  %v2776_v12 = vld [vmem:[%s5202_s12 + $0x20] sm:$0xff] }
 0xac8   :  { %v5052_v6 = vpop.permute.xlu0 %2718 }
 0xacc   :  { %v5054_v42 = vpop.permute.xlu0 %2734 }
 0xad0   :  { %v2717_v59 = vpop.permute.xlu0 %2716 }
 0xad1   :  { %v2760_v30 = vsel %vm767_vm2, %v4970_v44, %v2717_v59  ;;  %v2779_v44 = vld [vmem:[%s5202_s12 + $0x38] sm:$0xff] }
 0xad4   :  { %v2733_v47 = vpop.permute.xlu0 %2732 }
 0xad5   :  { %v2764_v61 = vsel %vm769_vm3, %v2760_v30, %v2733_v47 }
 0xad8   :  { %v2751_v50 = vpop.permute.xlu0 %2750 }
 0xadc   :  { %v2723_v4 = vpop.permute.xlu0 %2722 }
 0xae0   :  { %v2739_v1 = vpop.permute.xlu0 %2738 }
 0xae4   :  { %v2721_v19 = vpop.permute.xlu0 %2720 }
 0xae8   :  { %v2737_v59 = vpop.permute.xlu0 %2736 }
 0xb38   :  { %v5044_v25 = vpop.f32.mrb[26].mxu1 }
 0xb39   :  { %v5046_v55 = vpop.f32.mrb[27].mxu1 }
 0xb3c   :  { %v5048_v18 = vpop.f32.mrb[28].mxu1 }
 0xb3d   :  { %v5050_v3 = vpop.f32.mrb[29].mxu1 }
 0xb58   :  { %v3502_v2 = vpop.f32.mrb[30].mxu1 }
 0xb59   :  { %v3195_v38 = vmul.f32 -1.442695, %v3502_v2  ;;  %v2426_v53 = vpop.f32.mrb[31].mxu1 }
 0xb5a   :  { %v3194_v57 = vmul.f32 -1.442695, %v2426_v53 }
 0xb5b   :  { %3847 = vpow2.f32 %v3195_v38  ;;  %v3643_v38 = vpack.c.bf16 %v2777_v39, %v2776_v12 }
 0xb5c   :  { %3849 = vpow2.f32 %v3194_v57  ;;  %v3505_v16 = vpop.f32.mrb[32].mxu1  ;;  %v2778_v57 = vld [vmem:[%s5202_s12 + $0x30] sm:$0xff] }
 0xb5d   :  { %v3197_v31 = vmul.f32 -1.442695, %v3505_v16  ;;  %v2436_v37 = vpop.f32.mrb[33].mxu1 }
 0xb5e   :  { %v3196_v40 = vmul.f32 -1.442695, %v2436_v37 }
 0xb5f   :  { %3851 = vpow2.f32 %v3197_v31  ;;  %v2761_v31 = vsel %vm767_vm2, %v4968_v17, %v5052_v6 }
 0xb60   :  { %3853 = vpow2.f32 %v3196_v40  ;;  %v2762_v40 = vsel %vm767_vm2, %v4980_v34, %v2721_v19  ;;  %v2601_v34 = vld [vmem:[%s5205_s15] sm:$0xff] }
 0xb65   :  { %v3848_v43 = vpop.eup %3847 }
 0xb66   :  { %v3850_v22 = vpop.eup %3849  ;;  %v2458_v32 = vadd.f32 1.0, %v3848_v43 }
 0xb67   :  { %v2457_v56 = vadd.f32 1.0, %v3850_v22  ;;  %v2766_v22 = vsel %vm769_vm3, %v2762_v40, %v2737_v59 }
 0xb68   :  { %3855 = vrcp.f32 %v2458_v32 }
 0xb69   :  { %v3852_v9 = vpop.eup %3851  ;;  %3857 = vrcp.f32 %v2457_v56 }
 0xb6a   :  { %v3854_v48 = vpop.eup %3853  ;;  %v2460_v23 = vadd.f32 1.0, %v3852_v9  ;;  %v2763_v9 = vsel %vm767_vm2, %v4978_v5, %v2723_v4 }
 0xb6b   :  { %v2459_v27 = vadd.f32 1.0, %v3854_v48  ;;  %v2767_v17 = vsel %vm769_vm3, %v2763_v9, %v2739_v1 }
 0xb6c   :  { %3859 = vrcp.f32 %v2460_v23 }
 0xb6d   :  { %3861 = vrcp.f32 %v2459_v27 }
 0xb72   :  { %v3856_v24 = vpop.eup %3855 }
 0xb73   :  { %v3858_v46 = vpop.eup %3857  ;;  %v2470_v14 = vmul.f32 %v3856_v24, %v3502_v2 }
 0xb74   :  { %v2469_v8 = vmul.f32 %v3858_v46, %v2426_v53  ;;  %v2749_v53 = vpop.permute.xlu1 %2748 }
 0xb75   :  { %v2768_v47 = vsel %vm771_vm4, %v2764_v61, %v2749_v53 }
 0xb76   :  { %v3860_v15 = vpop.eup %3859  ;;  %3510 = vmatprep.mubr.msk.f32.mxu0 %vm767_vm2, %v2469_v8 }
 0xb77   :  { %v3862_v11 = vpop.eup %3861  ;;  %3511 = vmatmul.mubr.msk.f32.vlgmr.msra.gmra.mrb[16].mxu0 %vm767_vm2, %v2470_v14  ;;  %v2472_v2 = vmul.f32 %v3860_v15, %v3505_v16  ;;  %v2753_v16 = vpop.permute.xlu0 %2752 }
 0xb78   :  { %v2471_v35 = vmul.f32 %v3862_v11, %v2436_v37  ;;  %3638 = vmatpush3.bf16.msra.mxu0 %v3635_v58  ;;  %v3647_v58 = vpack.c.bf16 %v2779_v44, %v2778_v57  ;;  %v2765_v37 = vsel %vm769_vm3, %v2761_v31, %v5054_v42  ;;  %v2770_v32 = vsel %vm771_vm4, %v2766_v22, %v2753_v16  ;;  %v2602_v42 = vld [vmem:[%s5205_s15 + $0x8] sm:$0xff]  ;;  %s3944_s15 = smov [#allocation2]  }
 0xb79   :  { %3640 = vmatprep.subr.bf16.mxu0 %v3639_v63  ;;  %v2769_v43 = vsel %vm771_vm4, %v2765_v37, %v2751_v50  ;;  %v3631_v50 = vpack.c.bf16 %v2602_v42, %v2601_v34  ;;  %s3092_s9 = sshll.u32 %s3944_s15, 4  ;;  %s3093_s9 = int_to_ptr.vmem [resolvable:$true] %s3092_s9 }
 0xb7a   :  { %3513 = vmatprep.mubr.msk.f32.mxu0 %vm767_vm2, %v2471_v35  ;;  %s3897_s21 = scalar_lea.vmem %s3093_s9, 128  ;;  %p3902_p1 = scmp.lt.s32.totalorder %s3093_s9, %s3093_s9 }
 0xb7b   :  { %3514 = vmatmul.mubr.msk.f32.gmra.mrb[18].mxu0 %vm767_vm2, %v2472_v2  ;;  %v2755_v56 = vpop.permute.xlu0 %2754  ;;  %3632 = vmatprep.subr.bf16.mxu1 %v3631_v50  ;;  %p3898_p0 = scmp.ne.s32.totalorder %s3093_s9, %s3897_s21  ;;  %p3903_p2 = scmp.lt.s32.totalorder %s3897_s21, %s3897_s21 }
 0xb7c   :  { %3642 = vmatpush3.bf16.msra.mxu0 %v3639_v63  ;;  %3542 = vmatprep.mubr.msk.f32.mxu0 %vm773_vm5, %v2768_v47  ;;  %v2771_v6 = vsel %vm771_vm4, %v2767_v17, %v2755_v56 }
 0xb7d   :  { %3644 = vmatprep.subr.bf16.mxu0 %v3643_v38  ;;  %3634 = vmatpush3.bf16.msra.mxu1 %v3631_v50  ;;  %p3904_p3 = por %p3903_p2, %p3902_p1 }
 0xb7e   :  { %3651 = vmatprep.subr.bf16.mxu1 %v5249_v29 }
 0xb7f   :  { %p3905_p4 = pnand %p3904_p3, %p3898_p0 }
 0xb80   :  { %3646 = vmatpush3.bf16.msra.mxu0 %v3643_v38 }
 0xb81   :  { %3648 = vmatprep.subr.bf16.mxu0 %v3647_v58 }
 0xb84   :  { %3650 = vmatpush3.bf16.msra.mxu0 %v3647_v58 }
 0xb87   :  { %3543 = vmatmul.mubr.msk.f32.vlgmr.msra.gmra.mrb[20].mxu0 %vm773_vm5, %v2769_v43 }
 0xb88   :  { %3545 = vmatprep.mubr.msk.f32.mxu0 %vm773_vm5, %v2770_v32 }
 0xb8b   :  { %3546 = vmatmul.mubr.msk.f32.gmra.mrb[22].mxu0 %vm773_vm5, %v2771_v6 }
 0xc4a   :  { %v3512_v5 = vpop.f32.mrb[16].mxu0 }
 0xc4b   :  { %v3205_v4 = vmul.f32 -1.442695, %v3512_v5  ;;  %v2554_v48 = vpop.f32.mrb[17].mxu0 }
 0xc4c   :  { %v3204_v23 = vmul.f32 -1.442695, %v2554_v48 }
 0xc4d   :  { %3863 = vpow2.f32 %v3205_v4 }
 0xc4e   :  { %3865 = vpow2.f32 %v3204_v23  ;;  %v3515_v27 = vpop.f32.mrb[18].mxu0 }
 0xc4f   :  { %v3207_v1 = vmul.f32 -1.442695, %v3515_v27  ;;  %v2564_v24 = vpop.f32.mrb[19].mxu0 }
 0xc50   :  { %v3206_v28 = vmul.f32 -1.442695, %v2564_v24 }
 0xc51   :  { %3867 = vpow2.f32 %v3207_v1 }
 0xc52   :  { %3869 = vpow2.f32 %v3206_v28 }
 0xc57   :  { %v3864_v13 = vpop.eup %3863 }
 0xc58   :  { %v3866_v46 = vpop.eup %3865  ;;  %v2586_v8 = vadd.f32 1.0, %v3864_v13 }
 0xc59   :  { %v2585_v19 = vadd.f32 1.0, %v3866_v46 }
 0xc5a   :  { %3871 = vrcp.f32 %v2586_v8  ;;  %v3544_v14 = vpop.f32.mrb[20].mxu0 }
 0xc5b   :  { %v3868_v63 = vpop.eup %3867  ;;  %3873 = vrcp.f32 %v2585_v19  ;;  %v2858_v15 = vpop.f32.mrb[21].mxu0 }
 0xc5c   :  { %v3870_v12 = vpop.eup %3869  ;;  %v2588_v39 = vadd.f32 1.0, %v3868_v63 }
 0xc5d   :  { %v2587_v11 = vadd.f32 1.0, %v3870_v12 }
 0xc5e   :  { %3875 = vrcp.f32 %v2588_v39  ;;  %v3547_v30 = vpop.f32.mrb[22].mxu0 }
 0xc5f   :  { %3877 = vrcp.f32 %v2587_v11  ;;  %v2868_v61 = vpop.f32.mrb[23].mxu0 }
 0xc64   :  { %v3872_v35 = vpop.eup %3871 }
 0xc65   :  { %v3874_v2 = vpop.eup %3873  ;;  %v2598_v53 = vmul.f32 %v3872_v35, %v3512_v5 }
 0xc66   :  { %v2597_v38 = vmul.f32 %v3874_v2, %v2554_v48 }
 0xc68   :  { %v3876_v57 = vpop.eup %3875  ;;  %3520 = vmatprep.mubr.msk.f32.mxu1 %vm767_vm2, %v2597_v38 }
 0xc69   :  { %v3878_v44 = vpop.eup %3877  ;;  %3521 = vmatmul.mubr.msk.f32.vlgmr.msra.gmra.mrb[34].mxu1 %vm767_vm2, %v2598_v53  ;;  %v2600_v47 = vmul.f32 %v3876_v57, %v3515_v27 }
 0xc6a   :  { %v2599_v59 = vmul.f32 %v3878_v44, %v2564_v24 }
 0xc6c   :  { %3523 = vmatprep.mubr.msk.f32.mxu1 %vm767_vm2, %v2599_v59 }
 0xc6d   :  { %3524 = vmatmul.mubr.msk.f32.gmra.mrb[36].mxu1 %vm767_vm2, %v2600_v47 }
 0xc6e   :  { %3556 = vmatprep.mubr.msk.f32.mxu1 %vm3926_vm0, %v5241_v60  ;;  %vm5260_vm0 = vcmp.eq.s32.totalorder %v4159_v0, %v4209_v49 }
 0xd3c   :  { %v3522_v58 = vpop.f32.mrb[34].mxu1 }
 0xd3d   :  { %v5113_v16 = vmul.f32 %v3544_v14, %v3522_v58  ;;  %v2681_v31 = vpop.f32.mrb[35].mxu1 }
 0xd3e   :  { %v5115_v37 = vmul.f32 %v2858_v15, %v2681_v31 }
 0xd3f   :  { %v2882_v40 = vmul.f32 %v5044_v25, %v5113_v16 }
 0xd40   :  { %v3525_v43 = vpop.f32.mrb[36].mxu1  ;;  %v2881_v22 = vmul.f32 %v5115_v37, %v5046_v55 }
 0xd41   :  { %v5121_v32 = vmul.f32 %v3547_v30, %v3525_v43  ;;  %v2691_v56 = vpop.f32.mrb[37].mxu1  ;;  %v2888_v9 = vsel %vm767_vm2, %v2882_v40, 0.0 }
 0xd42   :  { %v5124_v17 = vmul.f32 %v2868_v61, %v2691_v56  ;;  %2889 = vadd.xlane.f32.xlu1 %v2888_v9  ;;  %v2885_v60 = vsel %vm767_vm2, %v2881_v22, 0.0 }
 0xd43   :  { %2886 = vadd.xlane.f32.xlu0 %v2885_v60  ;;  %v2884_v34 = vmul.f32 %v5048_v18, %v5121_v32 }
 0xd44   :  { %v2883_v6 = vmul.f32 %v5124_v17, %v5050_v3 }
 0xd45   :  { %v2894_v55 = vsel %vm767_vm2, %v2884_v34, 0.0 }
 0xd46   :  { %v2891_v25 = vsel %vm767_vm2, %v2883_v6, 0.0 }
 0xd47   :  { %2892 = vadd.xlane.f32.xlu0 %v2891_v25 }
 0xd4b   :  { %2895 = vadd.xlane.f32.xlu0 %v2894_v55 }
 0xdcf   :  { %v2890_v50 = vpop.xlane.xlu1 %2889 }
 0xdd0   :  { %v2887_v42 = vpop.xlane.xlu0 %2886  ;;  %v2898_v4 = vsel %vm657_vm12, %v2890_v50, -1e+30 }
 0xdd1   :  { %v2897_v3 = vsel %vm5260_vm0, %v2887_v42, -1e+30  ;;  %v2902_v18 = vsel %vm859_vm9, %v2898_v4, -inf }
 0xdd2   :  { %v2901_v23 = vsel %vm859_vm9, %v2897_v3, -inf }
 0xdd3   :  { %v2905_v28 = vmax.f32 %v2901_v23, %v2902_v18 }
 0xdd4   :  { %v2893_v5 = vpop.xlane.xlu0 %2892 }
 0xdd5   :  { %v2899_v48 = vsel %vm658_vm6, %v2893_v5, -1e+30 }
 0xdd6   :  { %v2903_v26 = vsel %vm859_vm9, %v2899_v48, -inf }
 0xdd8   :  { %v2896_v27 = vpop.xlane.xlu0 %2895 }
 0xdd9   :  { %v2900_v1 = vsel %vm659_vm14, %v2896_v27, -1e+30 }
 0xdda   :  { %v2904_v24 = vsel %vm859_vm9, %v2900_v1, -inf }
 0xddb   :  { %v2906_v49 = vmax.f32 %v2903_v26, %v2904_v24 }
 0xddd   :  { %v2907_v13 = vmax.f32 %v2905_v28, %v2906_v49 }
 0xddf   :  { %v2908_v46 = vrot.slane %v2907_v13, 4 }
 0xde1   :  { %v2909_v8 = vmax.f32 %v2907_v13, %v2908_v46 }
 0xde3   :  { %v2910_v20 = vrot.slane %v2909_v8, 2 }
 0xde5   :  { %v2911_v19 = vmax.f32 %v2909_v8, %v2910_v20 }
 0xde7   :  { %v2912_v14 = vrot.slane %v2911_v19, 1 }
 0xde9   :  { %v2913_v63 = vmax.f32 %v2911_v19, %v2912_v14 }
 0xdeb   :  { %v2915_v15 = vmul.f32 %v4604_v51, %v2913_v63  ;;  %v2914_v12 = vmul.f32 %v4224_v54, %v2913_v63  ;;  %v2917_v39 = vmul.f32 %v4636_v52, %v2913_v63  ;;  %v2916_v11 = vmul.f32 %v4617_v10, %v2913_v63 }
 0xded   :  { %v2921_v0 = vsel %vm859_vm9, %v2915_v15, 0.0  ;;  %v2918_v45 = vsel %vm859_vm9, %v2914_v12, 0.0  ;;  %v2927_v30 = vsel %vm859_vm9, %v2917_v39, 0.0  ;;  %v2924_v61 = vsel %vm859_vm9, %v2916_v11, 0.0 }
 0xdee   :  { %2922 = vadd.xlane.f32.xlu0 %v2921_v0  ;;  %2919 = vadd.xlane.f32.xlu1 %v2918_v45 }
 0xdf2   :  { %2928 = vadd.xlane.f32.xlu0 %v2927_v30  ;;  %2925 = vadd.xlane.f32.xlu1 %v2924_v61 }
 0xe7b   :  { %v2923_v35 = vpop.xlane.xlu0 %2922  ;;  %v2920_v51 = vpop.xlane.xlu1 %2919 }
 0xe7c   :  { %v2931_v2 = vsub.f32 %v2890_v50, %v2923_v35  ;;  %v2930_v54 = vsub.f32 %v2887_v42, %v2920_v51 }
 0xe7e   :  { %v2936_v38 = vmul.f32 1.442695, %v2931_v2  ;;  %v2934_v53 = vmul.f32 1.442695, %v2930_v54 }
 0xe7f   :  { %v2929_v57 = vpop.xlane.xlu0 %2928  ;;  %v2926_v44 = vpop.xlane.xlu1 %2925 }
 0xe80   :  { %3879 = vpow2.f32 %v2936_v38  ;;  %v2933_v52 = vsub.f32 %v2896_v27, %v2929_v57  ;;  %v2932_v59 = vsub.f32 %v2893_v5, %v2926_v44 }
 0xe81   :  { %3881 = vpow2.f32 %v2934_v53 }
 0xe82   :  { %v2940_v10 = vmul.f32 1.442695, %v2933_v52  ;;  %v2938_v47 = vmul.f32 1.442695, %v2932_v59 }
 0xe84   :  { %3883 = vpow2.f32 %v2940_v10 }
 0xe85   :  { %3885 = vpow2.f32 %v2938_v47 }
 0xe8a   :  { %v3880_v58 = vpop.eup %3879 }
 0xe8b   :  { %v3882_v31 = vpop.eup %3881  ;;  %v2943_v40 = vmul.f32 %v3880_v58, %v4644_v62 }
 0xe8c   :  { %v2942_v43 = vmul.f32 %v3882_v31, %v4623_v33 }
 0xe8d   :  { %3887 = vrsqrt.f32 %v2943_v40  ;;  %vm2955_vm4 = vcmp.eq.f32.partialorder %v2943_v40, inf  ;;  %v2958_v42 = vand.u32 2147483648, %v2943_v40  ;;  %vm2957_vm9 = vcmp.eq.f32.partialorder %v2943_v40, 0.0 }
 0xe8e   :  { %v3884_v22 = vpop.eup %3883  ;;  %3889 = vrsqrt.f32 %v2942_v43  ;;  %vm2948_vm5 = vcmp.eq.f32.partialorder %v2942_v43, inf  ;;  %v2951_v62 = vand.u32 2147483648, %v2942_v43  ;;  %vm2950_vm12 = vcmp.eq.f32.partialorder %v2942_v43, 0.0 }
 0xe8f   :  { %v3886_v56 = vpop.eup %3885  ;;  %v2945_v9 = vmul.f32 %v3884_v22, %v4670_v7 }
 0xe90   :  { %v2944_v60 = vmul.f32 %v3886_v56, %v4648_v21 }
 0xe91   :  { %3891 = vrsqrt.f32 %v2945_v9  ;;  %vm2969_vm6 = vcmp.eq.f32.partialorder %v2945_v9, inf  ;;  %v2972_v27 = vand.u32 2147483648, %v2945_v9  ;;  %vm2971_vm8 = vcmp.eq.f32.partialorder %v2945_v9, 0.0 }
 0xe92   :  { %3893 = vrsqrt.f32 %v2944_v60  ;;  %vm2962_vm14 = vcmp.eq.f32.partialorder %v2944_v60, inf  ;;  %v2965_v1 = vand.u32 2147483648, %v2944_v60  ;;  %vm2964_vm11 = vcmp.eq.f32.partialorder %v2944_v60, 0.0 }
 0xe97   :  { %v3888_v6 = vpop.eup %3887 }
 0xe98   :  { %v3890_v25 = vpop.eup %3889  ;;  %v2954_v34 = vmul.f32 %v3888_v6, %v2943_v40 }
 0xe99   :  { %v2947_v55 = vmul.f32 %v3890_v25, %v2942_v43 }
 0xe9a   :  { %v2956_v50 = vsel %vm2955_vm4, %v2943_v40, %v2954_v34 }
 0xe9b   :  { %v3892_v33 = vpop.eup %3891  ;;  %v2949_v5 = vsel %vm2948_vm5, %v2942_v43, %v2947_v55  ;;  %v2959_v4 = vsel %vm2957_vm9, %v2958_v42, %v2956_v50 }
 0xe9c   :  { %v3894_v3 = vpop.eup %3893  ;;  %v2952_v7 = vsel %vm2950_vm12, %v2951_v62, %v2949_v5  ;;  %v2975_v21 = vmul.f32 %v2959_v4, %v5113_v16  ;;  %v2968_v48 = vmul.f32 %v3892_v33, %v2945_v9 }
 0xe9d   :  { %v2974_v18 = vmul.f32 %v2952_v7, %v5115_v37  ;;  %v2961_v23 = vmul.f32 %v3894_v3, %v2944_v60 }
 0xe9e   :  { %v2970_v26 = vsel %vm2969_vm6, %v2945_v9, %v2968_v48 }
 0xe9f   :  { %v3722_v24 = vpack.i.bf16 %v2975_v21, %v2974_v18  ;;  %v2963_v28 = vsel %vm2962_vm14, %v2944_v60, %v2961_v23  ;;  %v2973_v49 = vsel %vm2971_vm8, %v2972_v27, %v2970_v26 }
 0xea0   :  { %v2966_v13 = vsel %vm2964_vm11, %v2965_v1, %v2963_v28  ;;  %v2977_v46 = vmul.f32 %v2973_v49, %v5121_v32 }
 0xea1   :  { %3723 = vrot.lane.b32.xlu1 %v3722_v24, %s3938_s10  ;;  %v2976_v16 = vmul.f32 %v2966_v13, %v5124_v17 }
 0xea3   :  { %v3727_v8 = vpack.i.bf16 %v2977_v46, %v2976_v16 }
 0xea5   :  { %3728 = vrot.lane.b32.xlu0 %v3727_v8, %s3938_s10 }
 0xf13   :  { %v3724_v37 = vpop.permute.xlu1 %3723 }
 0xf14   :  { %v3726_v20 = vunpack.i.h.bf16 %v3724_v37  ;;  %v3725_v19 = vunpack.i.l.bf16 %v3724_v37 }
 0xf16   :  { %v2995_v14 = vsel %vm1828_vm10, %v2943_v40, %v3726_v20  ;;  %v2994_v63 = vsel %vm1828_vm10, %v2942_v43, %v3725_v19 }
 0xf17   :  { %v3652_v15 = vpack.c.bf16 %v2995_v14, %v2994_v63  ;;  %v3729_v12 = vpop.permute.xlu0 %3728 }
 0xf18   :  { %v3731_v0 = vunpack.i.h.bf16 %v3729_v12  ;;  %v3730_v45 = vunpack.i.l.bf16 %v3729_v12 }
 0xf19   :  { %3653 = vmatpush3.bf16.msra.mxu1 %v3652_v15 }
 0xf1a   :  { %v2997_v32 = vsel %vm1828_vm10, %v2945_v9, %v3731_v0  ;;  %v2996_v39 = vsel %vm1828_vm10, %v2944_v60, %v3730_v45  ;;  %3654 = vmatprep.subr.bf16.mxu1 %v5249_v29 }
 0xf1b   :  { %v3655_v17 = vpack.c.bf16 %v2997_v32, %v2996_v39 }
 0xf1d   :  { %3656 = vmatpush3.bf16.msra.mxu1 %v3655_v17 }
 0xf20   :  { %3557 = vmatmul.mubr.msk.f32.vlgmr.msra.gmra.mrb[38].mxu1 %vm769_vm3, %v4897_v36 }
 0xff3   :  { %v3064_v11 = vpop.f32.mrb[38].mxu1 }
 0xff4   :  { %v3068_v30 = vmax.f32 %v3064_v11, 1e-30  ;;  %v3558_v61 = vpop.f32.mrb[39].mxu1 }
 0xff6   :  { %3895 = vrsqrt.f32 %v3068_v30 }
0x1000   :  { %v3896_v35 = vpop.eup %3895 }
0x1001   :  { %3072 = vperm.xlu1 %3732, %v3896_v35  }
0x1005   :  { %3077 = vrot.lane.b32.xlu1 %v4996_v41, %s3938_s10 }
0x1080   :  { %v3073_v51 = vpop.permute.xlu1 %3072 }
0x1081   :  { %v3075_v2 = vmul.f32 %v3073_v51, %v3064_v11 }
0x1084   :  { %v3078_v54 = vpop.permute.xlu1 %3077 }
0x1085   :  { %v3080_v38 = vadd.f32 %v3078_v54, %v3075_v2 }
0x1087   :  { %3082 = vrot.lane.b32.xlu0 %v3080_v38, %s3939_s30 }
0x10f9   :  { %v3083_v29 = vpop.permute.xlu0 %3082 }
0x10fa   :  { %3085 = vst.msk [vmem:[#allocation2] sm:$0xff] %vm767_vm2, %v3083_v29 }
0x10fb   :  { %3908 = shalt.err (!%p3905_p4)
}
0x10fc   :  { %s3909_s26 = scalar_lea.hbm %s5206_s16, 128 }
0x10fd   :  { %p3910_p5 = scmp.ne.s32.totalorder %s5206_s16, %s3909_s26  ;;  %p3913_p6 = scmp.lt.u32.totalorder %s3909_s26, %s5206_s16 }
0x10ff   :  { %p3915_p7 = pnand %p3913_p6, %p3910_p5 }
0x1101   :  { %3918 = shalt.err (!%p3915_p7)
}
0x1102   :  { %3095 = dma.vmem_to_hbm [thread:$0]  %s3093_s9, 128, %s5206_s16, [#allocation3]  }
0x1103   :  { %3919 = dma.done.wait [#allocation3], 128  }
0x1104   :  { %3920 = vsyncadd [#allocation3], 4294967168 }
0x1105   :  { %3099 = vsyncpa [#allocation3], 1 }

</bundles_post_ra>
